<compile_context>
chip_gen: v7x
topology: tpu7x:2x2x1
jax: 0.10.0
libtpu: 0.0.40
codegen_flags: <defaults>
</compile_context>

<pallas_src>
import functools

import jax
import jax.numpy as jnp
from jax import lax
from jax.experimental import pallas as pl
from jax.experimental.pallas import tpu as pltpu


def _layernorm(x, gamma, beta, eps=1e-5):
    mu = jnp.mean(x, axis=-1, keepdims=True)
    xc = x - mu
    var = jnp.mean(xc * xc, axis=-1, keepdims=True)
    return xc * lax.rsqrt(var + eps) * gamma + beta


def _gelu_exact(x):
    # Exact (erf-based) GELU matching torch.nn.GELU() default. erf is evaluated with
    # the Abramowitz-Stegun 7.1.26 rational approximation (|err| < 1.5e-7); the
    # divide is an approximate EUP reciprocal (error ~1e-4, well within tolerance).
    z = x * 0.7071067811865476
    az = jnp.abs(z)
    t = pl.reciprocal(1.0 + 0.3275911 * az, approx=True)
    poly = ((((1.061405429 * t - 1.453152027) * t + 1.421413741) * t
             - 0.284496736) * t + 0.254829592) * t
    erf_az = 1.0 - poly * jnp.exp(-az * az)
    erf_z = jnp.where(z >= 0, erf_az, -erf_az)
    return 0.5 * x * (1.0 + erf_z)


def _block_kernel(x_ref, ln1_w_ref, ln1_b_ref,
                  wqkv_ref, wo_ref, bo_ref,
                  ln2_w_ref, ln2_b_ref, w1_ref, b1_ref, w2_ref, b2_ref,
                  o_ref,
                  qkv_ref, ctx_ref,
                  *, num_heads, head_dim):
    bf16 = jnp.bfloat16
    f32 = jnp.float32
    C = num_heads * head_dim

    x = x_ref[...]                                               # (N, C) f32

    # ---------------- LayerNorm 1 + fused QKV projection ----------------
    # One (N,C) x (C,3C) matmul -> lane-dense (N, 3C) bf16 scratch.
    # qk scale is already folded into the q columns of wqkv (wrapper).
    y = _layernorm(x, ln1_w_ref[...], ln1_b_ref[...])
    yb = y.astype(bf16)
    qkv_ref[...] = jnp.dot(yb, wqkv_ref[...],
                           preferred_element_type=f32).astype(bf16)

    # ---------------- Attention core, one head at a time ----------------
    # Only one (N, N) f32 score block is live at a time (bounds peak VMEM).
    for h in range(num_heads):
        lo = h * head_dim
        q_h = qkv_ref[:, lo:lo + head_dim]                       # (N, D) bf16
        k_h = qkv_ref[:, C + lo:C + lo + head_dim]               # (N, D) bf16
        v_h = qkv_ref[:, 2 * C + lo:2 * C + lo + head_dim]       # (N, D) bf16
        s = lax.dot_general(q_h, k_h, (((1,), (1,)), ((), ())),
                            preferred_element_type=f32)          # q @ k^T, (N, N) f32
        m = jnp.max(s, axis=-1, keepdims=True)
        e = jnp.exp(s - m)
        denom = jnp.sum(e, axis=-1, keepdims=True)
        p = (e * pl.reciprocal(denom, approx=True)).astype(bf16)
        ctx_ref[:, lo:lo + head_dim] = jnp.dot(
            p, v_h, preferred_element_type=f32).astype(bf16)     # head h -> lanes h*D..

    # ---------------- Output projection (single full-depth matmul) + residual 1 ----
    attn_out = jnp.dot(ctx_ref[...], wo_ref[...],
                       preferred_element_type=f32) + bo_ref[...]
    x1 = x + attn_out

    # ---------------- LayerNorm 2 + MLP + residual 2 ----------------
    z = _layernorm(x1, ln2_w_ref[...], ln2_b_ref[...]).astype(bf16)
    hidden = jnp.dot(z, w1_ref[...], preferred_element_type=f32) + b1_ref[...]
    g = _gelu_exact(hidden).astype(bf16)
    mlp = jnp.dot(g, w2_ref[...], preferred_element_type=f32) + b2_ref[...]

    o_ref[...] = (x1 + mlp).astype(o_ref.dtype)


def pack_block_params(params, *, num_heads):
    """One-time repack of PyTorch-layout weights into kernel layouts (call at init).

    PyTorch layouts: w_qkv (3C, C), w_proj (C, C), b_proj (C,), ln*_w/ln*_b (C,),
    w_fc1 (M, C), b_fc1 (M,), w_fc2 (C, M), b_fc2 (C,).
    """
    C = params["w_qkv"].shape[1]
    D = C // num_heads
    M = params["w_fc1"].shape[0]
    scale = D ** (-0.5)
    bf16, f32 = jnp.bfloat16, jnp.float32

    wqkv = params["w_qkv"].T                                     # (C, 3C): [q | k | v]
    col_scale = jnp.concatenate(
        [jnp.full((C,), scale, dtype=f32), jnp.ones((2 * C,), dtype=f32)])
    wqkv = (wqkv * col_scale[None, :]).astype(bf16)              # fold qk scale into q

    return dict(
        num_heads=num_heads,
        wqkv=wqkv,                                               # (C, 3C) bf16
        wo=params["w_proj"].T.astype(bf16),                      # (C, C)  bf16
        bo=params["b_proj"].reshape(1, C).astype(f32),
        w1=params["w_fc1"].T.astype(bf16),                       # (C, M)  bf16
        b1=params["b_fc1"].reshape(1, M).astype(f32),
        w2=params["w_fc2"].T.astype(bf16),                       # (M, C)  bf16
        b2=params["b_fc2"].reshape(1, C).astype(f32),
        ln1_w=params["ln1_w"].reshape(1, C).astype(f32),
        ln1_b=params["ln1_b"].reshape(1, C).astype(f32),
        ln2_w=params["ln2_w"].reshape(1, C).astype(f32),
        ln2_b=params["ln2_b"].reshape(1, C).astype(f32),
    )


def block_forward(x, packed):
    """x: (B, N, C) f32; packed: output of pack_block_params()."""
    B, N, C = x.shape
    H = packed["num_heads"]
    D = C // H
    M = packed["w1"].shape[1]

    kernel = functools.partial(_block_kernel, num_heads=H, head_dim=D)
    inv2 = lambda b: (0, 0)   # grid-invariant 2-D operands

    return pl.pallas_call(
        kernel,
        out_shape=jax.ShapeDtypeStruct((B, N, C), x.dtype),
        grid_spec=pltpu.PrefetchScalarGridSpec(
            num_scalar_prefetch=0,
            grid=(B,),
            in_specs=[
                pl.BlockSpec((None, N, C), lambda b: (b, 0, 0)),  # x (batch squeezed)
                pl.BlockSpec((1, C), inv2), pl.BlockSpec((1, C), inv2),   # ln1 w, b
                pl.BlockSpec((C, 3 * C), inv2),                   # fused qkv weights
                pl.BlockSpec((C, C), inv2),                       # proj weights
                pl.BlockSpec((1, C), inv2),                       # proj bias
                pl.BlockSpec((1, C), inv2), pl.BlockSpec((1, C), inv2),   # ln2 w, b
                pl.BlockSpec((C, M), inv2), pl.BlockSpec((1, M), inv2),   # fc1 w, b
                pl.BlockSpec((M, C), inv2), pl.BlockSpec((1, C), inv2),   # fc2 w, b
            ],
            out_specs=pl.BlockSpec((None, N, C), lambda b: (b, 0, 0)),
            scratch_shapes=[
                pltpu.VMEM((N, 3 * C), jnp.bfloat16),   # fused qkv activations
                pltpu.VMEM((N, C), jnp.bfloat16),       # packed attention context
            ],
        ),
        compiler_params=pltpu.CompilerParams(
            dimension_semantics=("parallel",),
        ),
    )(x, packed["ln1_w"], packed["ln1_b"], packed["wqkv"], packed["wo"],
      packed["bo"], packed["ln2_w"], packed["ln2_b"], packed["w1"], packed["b1"],
      packed["w2"], packed["b2"])


def block_reference(x, params, *, num_heads):
    """Pure-JAX reference mirroring the PyTorch Block forward (eval mode)."""
    B, N, C = x.shape
    D = C // num_heads
    scale = D ** (-0.5)

    def ln(v, g, b, eps=1e-5):
        mu = v.mean(-1, keepdims=True)
        var = ((v - mu) ** 2).mean(-1, keepdims=True)
        return (v - mu) / jnp.sqrt(var + eps) * g + b

    y = ln(x, params["ln1_w"], params["ln1_b"])
    qkv = y @ params["w_qkv"].T                                    # (B, N, 3C)
    qkv = qkv.reshape(B, N, 3, num_heads, D).transpose(2, 0, 3, 1, 4)
    q, k, v = qkv[0], qkv[1], qkv[2]                               # (B, H, N, D)
    attn = jnp.einsum("bhnd,bhmd->bhnm", q, k) * scale
    attn = jax.nn.softmax(attn, axis=-1)
    ctx = jnp.einsum("bhnm,bhmd->bhnd", attn, v)
    ctx = ctx.transpose(0, 2, 1, 3).reshape(B, N, C)
    x1 = x + ctx @ params["w_proj"].T + params["b_proj"]

    z = ln(x1, params["ln2_w"], params["ln2_b"])
    h = z @ params["w_fc1"].T + params["b_fc1"]
    h = jax.nn.gelu(h, approximate=False)
    return x1 + h @ params["w_fc2"].T + params["b_fc2"]


if __name__ == "__main__":
    B, N, C = 2, 8, 32
    num_heads = 8
    M = 4 * C   # mlp_ratio = 4.0

    key = jax.random.PRNGKey(0)
    ks = jax.random.split(key, 12)
    f32 = jnp.float32
    x = jax.random.normal(ks[0], (B, N, C), dtype=f32)
    params = dict(
        ln1_w=1.0 + 0.1 * jax.random.normal(ks[1], (C,), dtype=f32),
        ln1_b=0.05 * jax.random.normal(ks[2], (C,), dtype=f32),
        w_qkv=0.05 * jax.random.normal(ks[3], (3 * C, C), dtype=f32),
        w_proj=0.05 * jax.random.normal(ks[4], (C, C), dtype=f32),
        b_proj=0.05 * jax.random.normal(ks[5], (C,), dtype=f32),
        ln2_w=1.0 + 0.1 * jax.random.normal(ks[6], (C,), dtype=f32),
        ln2_b=0.05 * jax.random.normal(ks[7], (C,), dtype=f32),
        w_fc1=0.05 * jax.random.normal(ks[8], (M, C), dtype=f32),
        b_fc1=0.05 * jax.random.normal(ks[9], (M,), dtype=f32),
        w_fc2=0.05 * jax.random.normal(ks[10], (C, M), dtype=f32),
        b_fc2=0.05 * jax.random.normal(ks[11], (C,), dtype=f32),
    )

    packed = pack_block_params(params, num_heads=num_heads)   # one-time pre-pack
    out = block_forward(x, packed)
    out = jax.block_until_ready(out)

    ref = block_reference(x, params, num_heads=num_heads)
    assert out.shape == (B, N, C)
    max_err = float(jnp.max(jnp.abs(out - ref)))
    # bf16 matmul operands (f32 accumulation) + approx reciprocals -> relaxed tolerance.
    assert jnp.allclose(out, ref, atol=3e-2, rtol=3e-2), f"mismatch vs reference: {max_err}"

    print("KERNEL_OK")
</pallas_src>

<mosaic_0001>
module attributes {stable_mosaic.version = 11 : i64} {
  func.func @_block_kernel(%arg0: i32, %arg1: memref<1x8x32xf32, #tpu.memory_space<vmem>>, %arg2: memref<1x32xf32, #tpu.memory_space<vmem>>, %arg3: memref<1x32xf32, #tpu.memory_space<vmem>>, %arg4: memref<32x96xbf16, #tpu.memory_space<vmem>>, %arg5: memref<32x32xbf16, #tpu.memory_space<vmem>>, %arg6: memref<1x32xf32, #tpu.memory_space<vmem>>, %arg7: memref<1x32xf32, #tpu.memory_space<vmem>>, %arg8: memref<1x32xf32, #tpu.memory_space<vmem>>, %arg9: memref<32x128xbf16, #tpu.memory_space<vmem>>, %arg10: memref<1x128xf32, #tpu.memory_space<vmem>>, %arg11: memref<128x32xbf16, #tpu.memory_space<vmem>>, %arg12: memref<1x32xf32, #tpu.memory_space<vmem>>, %arg13: memref<1x8x32xf32, #tpu.memory_space<vmem>>, %arg14: memref<8x96xbf16, #tpu.memory_space<vmem>>, %arg15: memref<8x32xbf16, #tpu.memory_space<vmem>>) attributes {dimension_semantics = [#tpu.dimension_semantics<parallel>], iteration_bounds = array<i64: 2>, scalar_prefetch = 0 : i64, scratch_operands = 2 : i64, tpu.core_type = #tpu.core_type<tc>, window_params = [{transform_indices = @transform_0, window_bounds = array<i64: 1, 8, 32>}, {pipeline_mode = #tpu.pipeline_mode<synchronous>, transform_indices = @transform_1, window_bounds = array<i64: 1, 32>}, {pipeline_mode = #tpu.pipeline_mode<synchronous>, transform_indices = @transform_2, window_bounds = array<i64: 1, 32>}, {pipeline_mode = #tpu.pipeline_mode<synchronous>, transform_indices = @transform_3, window_bounds = array<i64: 32, 96>}, {pipeline_mode = #tpu.pipeline_mode<synchronous>, transform_indices = @transform_4, window_bounds = array<i64: 32, 32>}, {pipeline_mode = #tpu.pipeline_mode<synchronous>, transform_indices = @transform_5, window_bounds = array<i64: 1, 32>}, {pipeline_mode = #tpu.pipeline_mode<synchronous>, transform_indices = @transform_6, window_bounds = array<i64: 1, 32>}, {pipeline_mode = #tpu.pipeline_mode<synchronous>, transform_indices = @transform_7, window_bounds = array<i64: 1, 32>}, {pipeline_mode = #tpu.pipeline_mode<synchronous>, transform_indices = @transform_8, window_bounds = array<i64: 32, 128>}, {pipeline_mode = #tpu.pipeline_mode<synchronous>, transform_indices = @transform_9, window_bounds = array<i64: 1, 128>}, {pipeline_mode = #tpu.pipeline_mode<synchronous>, transform_indices = @transform_10, window_bounds = array<i64: 128, 32>}, {pipeline_mode = #tpu.pipeline_mode<synchronous>, transform_indices = @transform_11, window_bounds = array<i64: 1, 32>}, {transform_indices = @transform_12, window_bounds = array<i64: 1, 8, 32>}]} {
    %c0 = arith.constant 0 : index
    %c0_0 = arith.constant 0 : index
    %c0_1 = arith.constant 0 : index
    %0 = vector.load %arg1[%c0, %c0_0, %c0_1] : memref<1x8x32xf32, #tpu.memory_space<vmem>>, vector<1x8x32xf32>
    %1 = vector.shape_cast %0 : vector<1x8x32xf32> to vector<8x32xf32>
    %c0_2 = arith.constant 0 : index
    %c0_3 = arith.constant 0 : index
    %2 = vector.load %arg2[%c0_2, %c0_3] : memref<1x32xf32, #tpu.memory_space<vmem>>, vector<1x32xf32>
    %c0_4 = arith.constant 0 : index
    %c0_5 = arith.constant 0 : index
    %3 = vector.load %arg3[%c0_4, %c0_5] : memref<1x32xf32, #tpu.memory_space<vmem>>, vector<1x32xf32>
    %cst = arith.constant dense<0.000000e+00> : vector<8xf32>
    %4 = vector.multi_reduction <add>, %1, %cst [1] : vector<8x32xf32> to vector<8xf32>
    %5 = vector.shape_cast %4 : vector<8xf32> to vector<8x1xf32>
    %cst_6 = arith.constant 3.200000e+01 : f32
    %6 = vector.broadcast %cst_6 : f32 to vector<8x1xf32>
    %7 = arith.divf %5, %6 : vector<8x1xf32>
    %8 = vector.broadcast %7 : vector<8x1xf32> to vector<8x32xf32>
    %9 = arith.subf %1, %8 : vector<8x32xf32>
    %10 = arith.mulf %9, %9 : vector<8x32xf32>
    %cst_7 = arith.constant dense<0.000000e+00> : vector<8xf32>
    %11 = vector.multi_reduction <add>, %10, %cst_7 [1] : vector<8x32xf32> to vector<8xf32>
    %12 = vector.shape_cast %11 : vector<8xf32> to vector<8x1xf32>
    %cst_8 = arith.constant 3.200000e+01 : f32
    %13 = vector.broadcast %cst_8 : f32 to vector<8x1xf32>
    %14 = arith.divf %12, %13 : vector<8x1xf32>
    %cst_9 = arith.constant 9.99999974E-6 : f32
    %15 = vector.broadcast %cst_9 : f32 to vector<8x1xf32>
    %16 = arith.addf %14, %15 : vector<8x1xf32>
    %17 = math.rsqrt %16 : vector<8x1xf32>
    %18 = vector.broadcast %17 : vector<8x1xf32> to vector<8x32xf32>
    %19 = arith.mulf %9, %18 : vector<8x32xf32>
    %20 = vector.broadcast %2 : vector<1x32xf32> to vector<8x32xf32>
    %21 = arith.mulf %19, %20 : vector<8x32xf32>
    %22 = vector.broadcast %3 : vector<1x32xf32> to vector<8x32xf32>
    %23 = arith.addf %21, %22 : vector<8x32xf32>
    %24 = arith.truncf %23 : vector<8x32xf32> to vector<8x32xbf16>
    %c0_10 = arith.constant 0 : index
    %c0_11 = arith.constant 0 : index
    %25 = vector.load %arg4[%c0_10, %c0_11] : memref<32x96xbf16, #tpu.memory_space<vmem>>, vector<32x96xbf16>
    %cst_12 = arith.constant dense<0.000000e+00> : vector<8x96xf32>
    %26 = tpu.matmul %24, %25, %cst_12 {dimension_numbers = #tpu.dot_dimension_numbers<[1], [0], [0], [1], [0, 0, 1, 1], [], []>} : vector<8x32xbf16>, vector<32x96xbf16>, vector<8x96xf32> -> vector<8x96xf32>
    %27 = arith.truncf %26 : vector<8x96xf32> to vector<8x96xbf16>
    %c0_13 = arith.constant 0 : index
    %c0_14 = arith.constant 0 : index
    %28 = vector.load %arg14[%c0_13, %c0_14] : memref<8x96xbf16, #tpu.memory_space<vmem>>, vector<8x96xbf16>
    tpu.vector_store %arg14[%c0_13, %c0_14], %27 {strides = array<i32>} : memref<8x96xbf16, #tpu.memory_space<vmem>>, vector<8x96xbf16>,
    %c0_15 = arith.constant 0 : index
    %c0_16 = arith.constant 0 : index
    %29 = vector.load %arg14[%c0_15, %c0_16] : memref<8x96xbf16, #tpu.memory_space<vmem>>, vector<8x4xbf16>
    %c0_17 = arith.constant 0 : index
    %c32 = arith.constant 32 : index
    %30 = vector.load %arg14[%c0_17, %c32] : memref<8x96xbf16, #tpu.memory_space<vmem>>, vector<8x4xbf16>
    %c0_18 = arith.constant 0 : index
    %c64 = arith.constant 64 : index
    %31 = vector.load %arg14[%c0_18, %c64] : memref<8x96xbf16, #tpu.memory_space<vmem>>, vector<8x4xbf16>
    %cst_19 = arith.constant dense<0.000000e+00> : vector<8x8xf32>
    %32 = tpu.matmul %29, %30, %cst_19 {dimension_numbers = #tpu.dot_dimension_numbers<[1], [1], [0], [0], [0, 0, 1, 0], [], []>} : vector<8x4xbf16>, vector<8x4xbf16>, vector<8x8xf32> -> vector<8x8xf32>
    %cst_20 = arith.constant dense<0xFF800000> : vector<8xf32>
    %33 = vector.multi_reduction <maximumf>, %32, %cst_20 [1] : vector<8x8xf32> to vector<8xf32>
    %34 = vector.shape_cast %33 : vector<8xf32> to vector<8x1xf32>
    %35 = vector.broadcast %34 : vector<8x1xf32> to vector<8x8xf32>
    %36 = arith.subf %32, %35 : vector<8x8xf32>
    %37 = math.exp %36 : vector<8x8xf32>
    %cst_21 = arith.constant dense<0.000000e+00> : vector<8xf32>
    %38 = vector.multi_reduction <add>, %37, %cst_21 [1] : vector<8x8xf32> to vector<8xf32>
    %39 = vector.shape_cast %38 : vector<8xf32> to vector<8x1xf32>
    %40 = tpu.reciprocal %39 {approx = true} : vector<8x1xf32> -> vector<8x1xf32>
    %41 = vector.broadcast %40 : vector<8x1xf32> to vector<8x8xf32>
    %42 = arith.mulf %37, %41 : vector<8x8xf32>
    %43 = arith.truncf %42 : vector<8x8xf32> to vector<8x8xbf16>
    %cst_22 = arith.constant dense<0.000000e+00> : vector<8x4xf32>
    %44 = tpu.matmul %43, %31, %cst_22 {dimension_numbers = #tpu.dot_dimension_numbers<[1], [0], [0], [1], [0, 0, 1, 1], [], []>} : vector<8x8xbf16>, vector<8x4xbf16>, vector<8x4xf32> -> vector<8x4xf32>
    %45 = arith.truncf %44 : vector<8x4xf32> to vector<8x4xbf16>
    %c0_23 = arith.constant 0 : index
    %c0_24 = arith.constant 0 : index
    %46 = vector.load %arg15[%c0_23, %c0_24] : memref<8x32xbf16, #tpu.memory_space<vmem>>, vector<8x4xbf16>
    tpu.vector_store %arg15[%c0_23, %c0_24], %45 {strides = array<i32>} : memref<8x32xbf16, #tpu.memory_space<vmem>>, vector<8x4xbf16>,
    %c0_25 = arith.constant 0 : index
    %c4 = arith.constant 4 : index
    %47 = vector.load %arg14[%c0_25, %c4] : memref<8x96xbf16, #tpu.memory_space<vmem>>, vector<8x4xbf16>
    %c0_26 = arith.constant 0 : index
    %c36 = arith.constant 36 : index
    %48 = vector.load %arg14[%c0_26, %c36] : memref<8x96xbf16, #tpu.memory_space<vmem>>, vector<8x4xbf16>
    %c0_27 = arith.constant 0 : index
    %c68 = arith.constant 68 : index
    %49 = vector.load %arg14[%c0_27, %c68] : memref<8x96xbf16, #tpu.memory_space<vmem>>, vector<8x4xbf16>
    %cst_28 = arith.constant dense<0.000000e+00> : vector<8x8xf32>
    %50 = tpu.matmul %47, %48, %cst_28 {dimension_numbers = #tpu.dot_dimension_numbers<[1], [1], [0], [0], [0, 0, 1, 0], [], []>} : vector<8x4xbf16>, vector<8x4xbf16>, vector<8x8xf32> -> vector<8x8xf32>
    %cst_29 = arith.constant dense<0xFF800000> : vector<8xf32>
    %51 = vector.multi_reduction <maximumf>, %50, %cst_29 [1] : vector<8x8xf32> to vector<8xf32>
    %52 = vector.shape_cast %51 : vector<8xf32> to vector<8x1xf32>
    %53 = vector.broadcast %52 : vector<8x1xf32> to vector<8x8xf32>
    %54 = arith.subf %50, %53 : vector<8x8xf32>
    %55 = math.exp %54 : vector<8x8xf32>
    %cst_30 = arith.constant dense<0.000000e+00> : vector<8xf32>
    %56 = vector.multi_reduction <add>, %55, %cst_30 [1] : vector<8x8xf32> to vector<8xf32>
    %57 = vector.shape_cast %56 : vector<8xf32> to vector<8x1xf32>
    %58 = tpu.reciprocal %57 {approx = true} : vector<8x1xf32> -> vector<8x1xf32>
    %59 = vector.broadcast %58 : vector<8x1xf32> to vector<8x8xf32>
    %60 = arith.mulf %55, %59 : vector<8x8xf32>
    %61 = arith.truncf %60 : vector<8x8xf32> to vector<8x8xbf16>
    %cst_31 = arith.constant dense<0.000000e+00> : vector<8x4xf32>
    %62 = tpu.matmul %61, %49, %cst_31 {dimension_numbers = #tpu.dot_dimension_numbers<[1], [0], [0], [1], [0, 0, 1, 1], [], []>} : vector<8x8xbf16>, vector<8x4xbf16>, vector<8x4xf32> -> vector<8x4xf32>
    %63 = arith.truncf %62 : vector<8x4xf32> to vector<8x4xbf16>
    %c0_32 = arith.constant 0 : index
    %c4_33 = arith.constant 4 : index
    %64 = vector.load %arg15[%c0_32, %c4_33] : memref<8x32xbf16, #tpu.memory_space<vmem>>, vector<8x4xbf16>
    tpu.vector_store %arg15[%c0_32, %c4_33], %63 {strides = array<i32>} : memref<8x32xbf16, #tpu.memory_space<vmem>>, vector<8x4xbf16>,
    %c0_34 = arith.constant 0 : index
    %c8 = arith.constant 8 : index
    %65 = vector.load %arg14[%c0_34, %c8] : memref<8x96xbf16, #tpu.memory_space<vmem>>, vector<8x4xbf16>
    %c0_35 = arith.constant 0 : index
    %c40 = arith.constant 40 : index
    %66 = vector.load %arg14[%c0_35, %c40] : memref<8x96xbf16, #tpu.memory_space<vmem>>, vector<8x4xbf16>
    %c0_36 = arith.constant 0 : index
    %c72 = arith.constant 72 : index
    %67 = vector.load %arg14[%c0_36, %c72] : memref<8x96xbf16, #tpu.memory_space<vmem>>, vector<8x4xbf16>
    %cst_37 = arith.constant dense<0.000000e+00> : vector<8x8xf32>
    %68 = tpu.matmul %65, %66, %cst_37 {dimension_numbers = #tpu.dot_dimension_numbers<[1], [1], [0], [0], [0, 0, 1, 0], [], []>} : vector<8x4xbf16>, vector<8x4xbf16>, vector<8x8xf32> -> vector<8x8xf32>
    %cst_38 = arith.constant dense<0xFF800000> : vector<8xf32>
    %69 = vector.multi_reduction <maximumf>, %68, %cst_38 [1] : vector<8x8xf32> to vector<8xf32>
    %70 = vector.shape_cast %69 : vector<8xf32> to vector<8x1xf32>
    %71 = vector.broadcast %70 : vector<8x1xf32> to vector<8x8xf32>
    %72 = arith.subf %68, %71 : vector<8x8xf32>
    %73 = math.exp %72 : vector<8x8xf32>
    %cst_39 = arith.constant dense<0.000000e+00> : vector<8xf32>
    %74 = vector.multi_reduction <add>, %73, %cst_39 [1] : vector<8x8xf32> to vector<8xf32>
    %75 = vector.shape_cast %74 : vector<8xf32> to vector<8x1xf32>
    %76 = tpu.reciprocal %75 {approx = true} : vector<8x1xf32> -> vector<8x1xf32>
    %77 = vector.broadcast %76 : vector<8x1xf32> to vector<8x8xf32>
    %78 = arith.mulf %73, %77 : vector<8x8xf32>
    %79 = arith.truncf %78 : vector<8x8xf32> to vector<8x8xbf16>
    %cst_40 = arith.constant dense<0.000000e+00> : vector<8x4xf32>
    %80 = tpu.matmul %79, %67, %cst_40 {dimension_numbers = #tpu.dot_dimension_numbers<[1], [0], [0], [1], [0, 0, 1, 1], [], []>} : vector<8x8xbf16>, vector<8x4xbf16>, vector<8x4xf32> -> vector<8x4xf32>
    %81 = arith.truncf %80 : vector<8x4xf32> to vector<8x4xbf16>
    %c0_41 = arith.constant 0 : index
    %c8_42 = arith.constant 8 : index
    %82 = vector.load %arg15[%c0_41, %c8_42] : memref<8x32xbf16, #tpu.memory_space<vmem>>, vector<8x4xbf16>
    tpu.vector_store %arg15[%c0_41, %c8_42], %81 {strides = array<i32>} : memref<8x32xbf16, #tpu.memory_space<vmem>>, vector<8x4xbf16>,
    %c0_43 = arith.constant 0 : index
    %c12 = arith.constant 12 : index
    %83 = vector.load %arg14[%c0_43, %c12] : memref<8x96xbf16, #tpu.memory_space<vmem>>, vector<8x4xbf16>
    %c0_44 = arith.constant 0 : index
    %c44 = arith.constant 44 : index
    %84 = vector.load %arg14[%c0_44, %c44] : memref<8x96xbf16, #tpu.memory_space<vmem>>, vector<8x4xbf16>
    %c0_45 = arith.constant 0 : index
    %c76 = arith.constant 76 : index
    %85 = vector.load %arg14[%c0_45, %c76] : memref<8x96xbf16, #tpu.memory_space<vmem>>, vector<8x4xbf16>
    %cst_46 = arith.constant dense<0.000000e+00> : vector<8x8xf32>
    %86 = tpu.matmul %83, %84, %cst_46 {dimension_numbers = #tpu.dot_dimension_numbers<[1], [1], [0], [0], [0, 0, 1, 0], [], []>} : vector<8x4xbf16>, vector<8x4xbf16>, vector<8x8xf32> -> vector<8x8xf32>
    %cst_47 = arith.constant dense<0xFF800000> : vector<8xf32>
    %87 = vector.multi_reduction <maximumf>, %86, %cst_47 [1] : vector<8x8xf32> to vector<8xf32>
    %88 = vector.shape_cast %87 : vector<8xf32> to vector<8x1xf32>
    %89 = vector.broadcast %88 : vector<8x1xf32> to vector<8x8xf32>
    %90 = arith.subf %86, %89 : vector<8x8xf32>
    %91 = math.exp %90 : vector<8x8xf32>
    %cst_48 = arith.constant dense<0.000000e+00> : vector<8xf32>
    %92 = vector.multi_reduction <add>, %91, %cst_48 [1] : vector<8x8xf32> to vector<8xf32>
    %93 = vector.shape_cast %92 : vector<8xf32> to vector<8x1xf32>
    %94 = tpu.reciprocal %93 {approx = true} : vector<8x1xf32> -> vector<8x1xf32>
    %95 = vector.broadcast %94 : vector<8x1xf32> to vector<8x8xf32>
    %96 = arith.mulf %91, %95 : vector<8x8xf32>
    %97 = arith.truncf %96 : vector<8x8xf32> to vector<8x8xbf16>
    %cst_49 = arith.constant dense<0.000000e+00> : vector<8x4xf32>
    %98 = tpu.matmul %97, %85, %cst_49 {dimension_numbers = #tpu.dot_dimension_numbers<[1], [0], [0], [1], [0, 0, 1, 1], [], []>} : vector<8x8xbf16>, vector<8x4xbf16>, vector<8x4xf32> -> vector<8x4xf32>
    %99 = arith.truncf %98 : vector<8x4xf32> to vector<8x4xbf16>
    %c0_50 = arith.constant 0 : index
    %c12_51 = arith.constant 12 : index
    %100 = vector.load %arg15[%c0_50, %c12_51] : memref<8x32xbf16, #tpu.memory_space<vmem>>, vector<8x4xbf16>
    tpu.vector_store %arg15[%c0_50, %c12_51], %99 {strides = array<i32>} : memref<8x32xbf16, #tpu.memory_space<vmem>>, vector<8x4xbf16>,
    %c0_52 = arith.constant 0 : index
    %c16 = arith.constant 16 : index
    %101 = vector.load %arg14[%c0_52, %c16] : memref<8x96xbf16, #tpu.memory_space<vmem>>, vector<8x4xbf16>
    %c0_53 = arith.constant 0 : index
    %c48 = arith.constant 48 : index
    %102 = vector.load %arg14[%c0_53, %c48] : memref<8x96xbf16, #tpu.memory_space<vmem>>, vector<8x4xbf16>
    %c0_54 = arith.constant 0 : index
    %c80 = arith.constant 80 : index
    %103 = vector.load %arg14[%c0_54, %c80] : memref<8x96xbf16, #tpu.memory_space<vmem>>, vector<8x4xbf16>
    %cst_55 = arith.constant dense<0.000000e+00> : vector<8x8xf32>
    %104 = tpu.matmul %101, %102, %cst_55 {dimension_numbers = #tpu.dot_dimension_numbers<[1], [1], [0], [0], [0, 0, 1, 0], [], []>} : vector<8x4xbf16>, vector<8x4xbf16>, vector<8x8xf32> -> vector<8x8xf32>
    %cst_56 = arith.constant dense<0xFF800000> : vector<8xf32>
    %105 = vector.multi_reduction <maximumf>, %104, %cst_56 [1] : vector<8x8xf32> to vector<8xf32>
    %106 = vector.shape_cast %105 : vector<8xf32> to vector<8x1xf32>
    %107 = vector.broadcast %106 : vector<8x1xf32> to vector<8x8xf32>
    %108 = arith.subf %104, %107 : vector<8x8xf32>
    %109 = math.exp %108 : vector<8x8xf32>
    %cst_57 = arith.constant dense<0.000000e+00> : vector<8xf32>
    %110 = vector.multi_reduction <add>, %109, %cst_57 [1] : vector<8x8xf32> to vector<8xf32>
    %111 = vector.shape_cast %110 : vector<8xf32> to vector<8x1xf32>
    %112 = tpu.reciprocal %111 {approx = true} : vector<8x1xf32> -> vector<8x1xf32>
    %113 = vector.broadcast %112 : vector<8x1xf32> to vector<8x8xf32>
    %114 = arith.mulf %109, %113 : vector<8x8xf32>
    %115 = arith.truncf %114 : vector<8x8xf32> to vector<8x8xbf16>
    %cst_58 = arith.constant dense<0.000000e+00> : vector<8x4xf32>
    %116 = tpu.matmul %115, %103, %cst_58 {dimension_numbers = #tpu.dot_dimension_numbers<[1], [0], [0], [1], [0, 0, 1, 1], [], []>} : vector<8x8xbf16>, vector<8x4xbf16>, vector<8x4xf32> -> vector<8x4xf32>
    %117 = arith.truncf %116 : vector<8x4xf32> to vector<8x4xbf16>
    %c0_59 = arith.constant 0 : index
    %c16_60 = arith.constant 16 : index
    %118 = vector.load %arg15[%c0_59, %c16_60] : memref<8x32xbf16, #tpu.memory_space<vmem>>, vector<8x4xbf16>
    tpu.vector_store %arg15[%c0_59, %c16_60], %117 {strides = array<i32>} : memref<8x32xbf16, #tpu.memory_space<vmem>>, vector<8x4xbf16>,
    %c0_61 = arith.constant 0 : index
    %c20 = arith.constant 20 : index
    %119 = vector.load %arg14[%c0_61, %c20] : memref<8x96xbf16, #tpu.memory_space<vmem>>, vector<8x4xbf16>
    %c0_62 = arith.constant 0 : index
    %c52 = arith.constant 52 : index
    %120 = vector.load %arg14[%c0_62, %c52] : memref<8x96xbf16, #tpu.memory_space<vmem>>, vector<8x4xbf16>
    %c0_63 = arith.constant 0 : index
    %c84 = arith.constant 84 : index
    %121 = vector.load %arg14[%c0_63, %c84] : memref<8x96xbf16, #tpu.memory_space<vmem>>, vector<8x4xbf16>
    %cst_64 = arith.constant dense<0.000000e+00> : vector<8x8xf32>
    %122 = tpu.matmul %119, %120, %cst_64 {dimension_numbers = #tpu.dot_dimension_numbers<[1], [1], [0], [0], [0, 0, 1, 0], [], []>} : vector<8x4xbf16>, vector<8x4xbf16>, vector<8x8xf32> -> vector<8x8xf32>
    %cst_65 = arith.constant dense<0xFF800000> : vector<8xf32>
    %123 = vector.multi_reduction <maximumf>, %122, %cst_65 [1] : vector<8x8xf32> to vector<8xf32>
    %124 = vector.shape_cast %123 : vector<8xf32> to vector<8x1xf32>
    %125 = vector.broadcast %124 : vector<8x1xf32> to vector<8x8xf32>
    %126 = arith.subf %122, %125 : vector<8x8xf32>
    %127 = math.exp %126 : vector<8x8xf32>
    %cst_66 = arith.constant dense<0.000000e+00> : vector<8xf32>
    %128 = vector.multi_reduction <add>, %127, %cst_66 [1] : vector<8x8xf32> to vector<8xf32>
    %129 = vector.shape_cast %128 : vector<8xf32> to vector<8x1xf32>
    %130 = tpu.reciprocal %129 {approx = true} : vector<8x1xf32> -> vector<8x1xf32>
    %131 = vector.broadcast %130 : vector<8x1xf32> to vector<8x8xf32>
    %132 = arith.mulf %127, %131 : vector<8x8xf32>
    %133 = arith.truncf %132 : vector<8x8xf32> to vector<8x8xbf16>
    %cst_67 = arith.constant dense<0.000000e+00> : vector<8x4xf32>
    %134 = tpu.matmul %133, %121, %cst_67 {dimension_numbers = #tpu.dot_dimension_numbers<[1], [0], [0], [1], [0, 0, 1, 1], [], []>} : vector<8x8xbf16>, vector<8x4xbf16>, vector<8x4xf32> -> vector<8x4xf32>
    %135 = arith.truncf %134 : vector<8x4xf32> to vector<8x4xbf16>
    %c0_68 = arith.constant 0 : index
    %c20_69 = arith.constant 20 : index
    %136 = vector.load %arg15[%c0_68, %c20_69] : memref<8x32xbf16, #tpu.memory_space<vmem>>, vector<8x4xbf16>
    tpu.vector_store %arg15[%c0_68, %c20_69], %135 {strides = array<i32>} : memref<8x32xbf16, #tpu.memory_space<vmem>>, vector<8x4xbf16>,
    %c0_70 = arith.constant 0 : index
    %c24 = arith.constant 24 : index
    %137 = vector.load %arg14[%c0_70, %c24] : memref<8x96xbf16, #tpu.memory_space<vmem>>, vector<8x4xbf16>
    %c0_71 = arith.constant 0 : index
    %c56 = arith.constant 56 : index
    %138 = vector.load %arg14[%c0_71, %c56] : memref<8x96xbf16, #tpu.memory_space<vmem>>, vector<8x4xbf16>
    %c0_72 = arith.constant 0 : index
    %c88 = arith.constant 88 : index
    %139 = vector.load %arg14[%c0_72, %c88] : memref<8x96xbf16, #tpu.memory_space<vmem>>, vector<8x4xbf16>
    %cst_73 = arith.constant dense<0.000000e+00> : vector<8x8xf32>
    %140 = tpu.matmul %137, %138, %cst_73 {dimension_numbers = #tpu.dot_dimension_numbers<[1], [1], [0], [0], [0, 0, 1, 0], [], []>} : vector<8x4xbf16>, vector<8x4xbf16>, vector<8x8xf32> -> vector<8x8xf32>
    %cst_74 = arith.constant dense<0xFF800000> : vector<8xf32>
    %141 = vector.multi_reduction <maximumf>, %140, %cst_74 [1] : vector<8x8xf32> to vector<8xf32>
    %142 = vector.shape_cast %141 : vector<8xf32> to vector<8x1xf32>
    %143 = vector.broadcast %142 : vector<8x1xf32> to vector<8x8xf32>
    %144 = arith.subf %140, %143 : vector<8x8xf32>
    %145 = math.exp %144 : vector<8x8xf32>
    %cst_75 = arith.constant dense<0.000000e+00> : vector<8xf32>
    %146 = vector.multi_reduction <add>, %145, %cst_75 [1] : vector<8x8xf32> to vector<8xf32>
    %147 = vector.shape_cast %146 : vector<8xf32> to vector<8x1xf32>
    %148 = tpu.reciprocal %147 {approx = true} : vector<8x1xf32> -> vector<8x1xf32>
    %149 = vector.broadcast %148 : vector<8x1xf32> to vector<8x8xf32>
    %150 = arith.mulf %145, %149 : vector<8x8xf32>
    %151 = arith.truncf %150 : vector<8x8xf32> to vector<8x8xbf16>
    %cst_76 = arith.constant dense<0.000000e+00> : vector<8x4xf32>
    %152 = tpu.matmul %151, %139, %cst_76 {dimension_numbers = #tpu.dot_dimension_numbers<[1], [0], [0], [1], [0, 0, 1, 1], [], []>} : vector<8x8xbf16>, vector<8x4xbf16>, vector<8x4xf32> -> vector<8x4xf32>
    %153 = arith.truncf %152 : vector<8x4xf32> to vector<8x4xbf16>
    %c0_77 = arith.constant 0 : index
    %c24_78 = arith.constant 24 : index
    %154 = vector.load %arg15[%c0_77, %c24_78] : memref<8x32xbf16, #tpu.memory_space<vmem>>, vector<8x4xbf16>
    tpu.vector_store %arg15[%c0_77, %c24_78], %153 {strides = array<i32>} : memref<8x32xbf16, #tpu.memory_space<vmem>>, vector<8x4xbf16>,
    %c0_79 = arith.constant 0 : index
    %c28 = arith.constant 28 : index
    %155 = vector.load %arg14[%c0_79, %c28] : memref<8x96xbf16, #tpu.memory_space<vmem>>, vector<8x4xbf16>
    %c0_80 = arith.constant 0 : index
    %c60 = arith.constant 60 : index
    %156 = vector.load %arg14[%c0_80, %c60] : memref<8x96xbf16, #tpu.memory_space<vmem>>, vector<8x4xbf16>
    %c0_81 = arith.constant 0 : index
    %c92 = arith.constant 92 : index
    %157 = vector.load %arg14[%c0_81, %c92] : memref<8x96xbf16, #tpu.memory_space<vmem>>, vector<8x4xbf16>
    %cst_82 = arith.constant dense<0.000000e+00> : vector<8x8xf32>
    %158 = tpu.matmul %155, %156, %cst_82 {dimension_numbers = #tpu.dot_dimension_numbers<[1], [1], [0], [0], [0, 0, 1, 0], [], []>} : vector<8x4xbf16>, vector<8x4xbf16>, vector<8x8xf32> -> vector<8x8xf32>
    %cst_83 = arith.constant dense<0xFF800000> : vector<8xf32>
    %159 = vector.multi_reduction <maximumf>, %158, %cst_83 [1] : vector<8x8xf32> to vector<8xf32>
    %160 = vector.shape_cast %159 : vector<8xf32> to vector<8x1xf32>
    %161 = vector.broadcast %160 : vector<8x1xf32> to vector<8x8xf32>
    %162 = arith.subf %158, %161 : vector<8x8xf32>
    %163 = math.exp %162 : vector<8x8xf32>
    %cst_84 = arith.constant dense<0.000000e+00> : vector<8xf32>
    %164 = vector.multi_reduction <add>, %163, %cst_84 [1] : vector<8x8xf32> to vector<8xf32>
    %165 = vector.shape_cast %164 : vector<8xf32> to vector<8x1xf32>
    %166 = tpu.reciprocal %165 {approx = true} : vector<8x1xf32> -> vector<8x1xf32>
    %167 = vector.broadcast %166 : vector<8x1xf32> to vector<8x8xf32>
    %168 = arith.mulf %163, %167 : vector<8x8xf32>
    %169 = arith.truncf %168 : vector<8x8xf32> to vector<8x8xbf16>
    %cst_85 = arith.constant dense<0.000000e+00> : vector<8x4xf32>
    %170 = tpu.matmul %169, %157, %cst_85 {dimension_numbers = #tpu.dot_dimension_numbers<[1], [0], [0], [1], [0, 0, 1, 1], [], []>} : vector<8x8xbf16>, vector<8x4xbf16>, vector<8x4xf32> -> vector<8x4xf32>
    %171 = arith.truncf %170 : vector<8x4xf32> to vector<8x4xbf16>
    %c0_86 = arith.constant 0 : index
    %c28_87 = arith.constant 28 : index
    %172 = vector.load %arg15[%c0_86, %c28_87] : memref<8x32xbf16, #tpu.memory_space<vmem>>, vector<8x4xbf16>
    tpu.vector_store %arg15[%c0_86, %c28_87], %171 {strides = array<i32>} : memref<8x32xbf16, #tpu.memory_space<vmem>>, vector<8x4xbf16>,
    %c0_88 = arith.constant 0 : index
    %c0_89 = arith.constant 0 : index
    %173 = vector.load %arg15[%c0_88, %c0_89] : memref<8x32xbf16, #tpu.memory_space<vmem>>, vector<8x32xbf16>
    %c0_90 = arith.constant 0 : index
    %c0_91 = arith.constant 0 : index
    %174 = vector.load %arg5[%c0_90, %c0_91] : memref<32x32xbf16, #tpu.memory_space<vmem>>, vector<32x32xbf16>
    %cst_92 = arith.constant dense<0.000000e+00> : vector<8x32xf32>
    %175 = tpu.matmul %173, %174, %cst_92 {dimension_numbers = #tpu.dot_dimension_numbers<[1], [0], [0], [1], [0, 0, 1, 1], [], []>} : vector<8x32xbf16>, vector<32x32xbf16>, vector<8x32xf32> -> vector<8x32xf32>
    %c0_93 = arith.constant 0 : index
    %c0_94 = arith.constant 0 : index
    %176 = vector.load %arg6[%c0_93, %c0_94] : memref<1x32xf32, #tpu.memory_space<vmem>>, vector<1x32xf32>
    %177 = vector.broadcast %176 : vector<1x32xf32> to vector<8x32xf32>
    %178 = arith.addf %175, %177 : vector<8x32xf32>
    %179 = arith.addf %1, %178 : vector<8x32xf32>
    %c0_95 = arith.constant 0 : index
    %c0_96 = arith.constant 0 : index
    %180 = vector.load %arg7[%c0_95, %c0_96] : memref<1x32xf32, #tpu.memory_space<vmem>>, vector<1x32xf32>
    %c0_97 = arith.constant 0 : index
    %c0_98 = arith.constant 0 : index
    %181 = vector.load %arg8[%c0_97, %c0_98] : memref<1x32xf32, #tpu.memory_space<vmem>>, vector<1x32xf32>
    %cst_99 = arith.constant dense<0.000000e+00> : vector<8xf32>
    %182 = vector.multi_reduction <add>, %179, %cst_99 [1] : vector<8x32xf32> to vector<8xf32>
    %183 = vector.shape_cast %182 : vector<8xf32> to vector<8x1xf32>
    %cst_100 = arith.constant 3.200000e+01 : f32
    %184 = vector.broadcast %cst_100 : f32 to vector<8x1xf32>
    %185 = arith.divf %183, %184 : vector<8x1xf32>
    %186 = vector.broadcast %185 : vector<8x1xf32> to vector<8x32xf32>
    %187 = arith.subf %179, %186 : vector<8x32xf32>
    %188 = arith.mulf %187, %187 : vector<8x32xf32>
    %cst_101 = arith.constant dense<0.000000e+00> : vector<8xf32>
    %189 = vector.multi_reduction <add>, %188, %cst_101 [1] : vector<8x32xf32> to vector<8xf32>
    %190 = vector.shape_cast %189 : vector<8xf32> to vector<8x1xf32>
    %cst_102 = arith.constant 3.200000e+01 : f32
    %191 = vector.broadcast %cst_102 : f32 to vector<8x1xf32>
    %192 = arith.divf %190, %191 : vector<8x1xf32>
    %cst_103 = arith.constant 9.99999974E-6 : f32
    %193 = vector.broadcast %cst_103 : f32 to vector<8x1xf32>
    %194 = arith.addf %192, %193 : vector<8x1xf32>
    %195 = math.rsqrt %194 : vector<8x1xf32>
    %196 = vector.broadcast %195 : vector<8x1xf32> to vector<8x32xf32>
    %197 = arith.mulf %187, %196 : vector<8x32xf32>
    %198 = vector.broadcast %180 : vector<1x32xf32> to vector<8x32xf32>
    %199 = arith.mulf %197, %198 : vector<8x32xf32>
    %200 = vector.broadcast %181 : vector<1x32xf32> to vector<8x32xf32>
    %201 = arith.addf %199, %200 : vector<8x32xf32>
    %202 = arith.truncf %201 : vector<8x32xf32> to vector<8x32xbf16>
    %c0_104 = arith.constant 0 : index
    %c0_105 = arith.constant 0 : index
    %203 = vector.load %arg9[%c0_104, %c0_105] : memref<32x128xbf16, #tpu.memory_space<vmem>>, vector<32x128xbf16>
    %cst_106 = arith.constant dense<0.000000e+00> : vector<8x128xf32>
    %204 = tpu.matmul %202, %203, %cst_106 {dimension_numbers = #tpu.dot_dimension_numbers<[1], [0], [0], [1], [0, 0, 1, 1], [], []>} : vector<8x32xbf16>, vector<32x128xbf16>, vector<8x128xf32> -> vector<8x128xf32>
    %c0_107 = arith.constant 0 : index
    %c0_108 = arith.constant 0 : index
    %205 = vector.load %arg10[%c0_107, %c0_108] : memref<1x128xf32, #tpu.memory_space<vmem>>, vector<1x128xf32>
    %206 = vector.broadcast %205 : vector<1x128xf32> to vector<8x128xf32>
    %207 = arith.addf %204, %206 : vector<8x128xf32>
    %cst_109 = arith.constant 0.707106769 : f32
    %208 = vector.broadcast %cst_109 : f32 to vector<8x128xf32>
    %209 = arith.mulf %207, %208 : vector<8x128xf32>
    %210 = math.absf %209 : vector<8x128xf32>
    %cst_110 = arith.constant 0.327591091 : f32
    %211 = vector.broadcast %cst_110 : f32 to vector<8x128xf32>
    %212 = arith.mulf %211, %210 : vector<8x128xf32>
    %cst_111 = arith.constant 1.000000e+00 : f32
    %213 = vector.broadcast %cst_111 : f32 to vector<8x128xf32>
    %214 = arith.addf %213, %212 : vector<8x128xf32>
    %215 = tpu.reciprocal %214 {approx = true} : vector<8x128xf32> -> vector<8x128xf32>
    %cst_112 = arith.constant 1.06140542 : f32
    %216 = vector.broadcast %cst_112 : f32 to vector<8x128xf32>
    %217 = arith.mulf %216, %215 : vector<8x128xf32>
    %cst_113 = arith.constant 1.45315206 : f32
    %218 = vector.broadcast %cst_113 : f32 to vector<8x128xf32>
    %219 = arith.subf %217, %218 : vector<8x128xf32>
    %220 = arith.mulf %219, %215 : vector<8x128xf32>
    %cst_114 = arith.constant 1.42141378 : f32
    %221 = vector.broadcast %cst_114 : f32 to vector<8x128xf32>
    %222 = arith.addf %220, %221 : vector<8x128xf32>
    %223 = arith.mulf %222, %215 : vector<8x128xf32>
    %cst_115 = arith.constant 0.284496725 : f32
    %224 = vector.broadcast %cst_115 : f32 to vector<8x128xf32>
    %225 = arith.subf %223, %224 : vector<8x128xf32>
    %226 = arith.mulf %225, %215 : vector<8x128xf32>
    %cst_116 = arith.constant 0.254829586 : f32
    %227 = vector.broadcast %cst_116 : f32 to vector<8x128xf32>
    %228 = arith.addf %226, %227 : vector<8x128xf32>
    %229 = arith.mulf %228, %215 : vector<8x128xf32>
    %cst_117 = arith.constant 0.000000e+00 : f32
    %230 = vector.broadcast %cst_117 : f32 to vector<8x128xf32>
    %231 = arith.subf %230, %210 : vector<8x128xf32>
    %232 = arith.mulf %231, %210 : vector<8x128xf32>
    %233 = math.exp %232 : vector<8x128xf32>
    %234 = arith.mulf %229, %233 : vector<8x128xf32>
    %cst_118 = arith.constant 1.000000e+00 : f32
    %235 = vector.broadcast %cst_118 : f32 to vector<8x128xf32>
    %236 = arith.subf %235, %234 : vector<8x128xf32>
    %cst_119 = arith.constant 0.000000e+00 : f32
    %237 = vector.broadcast %cst_119 : f32 to vector<8x128xf32>
    %238 = arith.cmpf oge, %209, %237 : vector<8x128xf32>
    %cst_120 = arith.constant 0.000000e+00 : f32
    %239 = vector.broadcast %cst_120 : f32 to vector<8x128xf32>
    %240 = arith.subf %239, %236 : vector<8x128xf32>
    %241 = arith.select %238, %236, %240 : vector<8x128xi1>, vector<8x128xf32>
    %cst_121 = arith.constant 5.000000e-01 : f32
    %242 = vector.broadcast %cst_121 : f32 to vector<8x128xf32>
    %243 = arith.mulf %242, %207 : vector<8x128xf32>
    %cst_122 = arith.constant 1.000000e+00 : f32
    %244 = vector.broadcast %cst_122 : f32 to vector<8x128xf32>
    %245 = arith.addf %244, %241 : vector<8x128xf32>
    %246 = arith.mulf %243, %245 : vector<8x128xf32>
    %247 = arith.truncf %246 : vector<8x128xf32> to vector<8x128xbf16>
    %c0_123 = arith.constant 0 : index
    %c0_124 = arith.constant 0 : index
    %248 = vector.load %arg11[%c0_123, %c0_124] : memref<128x32xbf16, #tpu.memory_space<vmem>>, vector<128x32xbf16>
    %cst_125 = arith.constant dense<0.000000e+00> : vector<8x32xf32>
    %249 = tpu.matmul %247, %248, %cst_125 {dimension_numbers = #tpu.dot_dimension_numbers<[1], [0], [0], [1], [0, 0, 1, 1], [], []>} : vector<8x128xbf16>, vector<128x32xbf16>, vector<8x32xf32> -> vector<8x32xf32>
    %c0_126 = arith.constant 0 : index
    %c0_127 = arith.constant 0 : index
    %250 = vector.load %arg12[%c0_126, %c0_127] : memref<1x32xf32, #tpu.memory_space<vmem>>, vector<1x32xf32>
    %251 = vector.broadcast %250 : vector<1x32xf32> to vector<8x32xf32>
    %252 = arith.addf %249, %251 : vector<8x32xf32>
    %253 = arith.addf %179, %252 : vector<8x32xf32>
    %c0_128 = arith.constant 0 : index
    %c0_129 = arith.constant 0 : index
    %c0_130 = arith.constant 0 : index
    %254 = vector.load %arg13[%c0_128, %c0_129, %c0_130] : memref<1x8x32xf32, #tpu.memory_space<vmem>>, vector<1x8x32xf32>
    %255 = vector.shape_cast %254 : vector<1x8x32xf32> to vector<8x32xf32>
    %256 = vector.shape_cast %253 : vector<8x32xf32> to vector<1x8x32xf32>
    tpu.vector_store %arg13[%c0_128, %c0_129, %c0_130], %256 {strides = array<i32>} : memref<1x8x32xf32, #tpu.memory_space<vmem>>, vector<1x8x32xf32>,
    return
  }
  func.func @transform_0(%arg0: i32) -> (i32, i32, i32) {
    %c0_i32 = arith.constant 0 : i32
    %c0_i32_0 = arith.constant 0 : i32
    %c0_i32_1 = arith.constant 0 : i32
    return %arg0, %c0_i32, %c0_i32_0 : i32, i32, i32
  }
  func.func @transform_1(%arg0: i32) -> (i32, i32) {
    %c0_i32 = arith.constant 0 : i32
    %c0_i32_0 = arith.constant 0 : i32
    %c0_i32_1 = arith.constant 0 : i32
    return %c0_i32, %c0_i32_0 : i32, i32
  }
  func.func @transform_2(%arg0: i32) -> (i32, i32) {
    %c0_i32 = arith.constant 0 : i32
    %c0_i32_0 = arith.constant 0 : i32
    %c0_i32_1 = arith.constant 0 : i32
    return %c0_i32, %c0_i32_0 : i32, i32
  }
  func.func @transform_3(%arg0: i32) -> (i32, i32) {
    %c0_i32 = arith.constant 0 : i32
    %c0_i32_0 = arith.constant 0 : i32
    %c0_i32_1 = arith.constant 0 : i32
    return %c0_i32, %c0_i32_0 : i32, i32
  }
  func.func @transform_4(%arg0: i32) -> (i32, i32) {
    %c0_i32 = arith.constant 0 : i32
    %c0_i32_0 = arith.constant 0 : i32
    %c0_i32_1 = arith.constant 0 : i32
    return %c0_i32, %c0_i32_0 : i32, i32
  }
  func.func @transform_5(%arg0: i32) -> (i32, i32) {
    %c0_i32 = arith.constant 0 : i32
    %c0_i32_0 = arith.constant 0 : i32
    %c0_i32_1 = arith.constant 0 : i32
    return %c0_i32, %c0_i32_0 : i32, i32
  }
  func.func @transform_6(%arg0: i32) -> (i32, i32) {
    %c0_i32 = arith.constant 0 : i32
    %c0_i32_0 = arith.constant 0 : i32
    %c0_i32_1 = arith.constant 0 : i32
    return %c0_i32, %c0_i32_0 : i32, i32
  }
  func.func @transform_7(%arg0: i32) -> (i32, i32) {
    %c0_i32 = arith.constant 0 : i32
    %c0_i32_0 = arith.constant 0 : i32
    %c0_i32_1 = arith.constant 0 : i32
    return %c0_i32, %c0_i32_0 : i32, i32
  }
  func.func @transform_8(%arg0: i32) -> (i32, i32) {
    %c0_i32 = arith.constant 0 : i32
    %c0_i32_0 = arith.constant 0 : i32
    %c0_i32_1 = arith.constant 0 : i32
    return %c0_i32, %c0_i32_0 : i32, i32
  }
  func.func @transform_9(%arg0: i32) -> (i32, i32) {
    %c0_i32 = arith.constant 0 : i32
    %c0_i32_0 = arith.constant 0 : i32
    %c0_i32_1 = arith.constant 0 : i32
    return %c0_i32, %c0_i32_0 : i32, i32
  }
  func.func @transform_10(%arg0: i32) -> (i32, i32) {
    %c0_i32 = arith.constant 0 : i32
    %c0_i32_0 = arith.constant 0 : i32
    %c0_i32_1 = arith.constant 0 : i32
    return %c0_i32, %c0_i32_0 : i32, i32
  }
  func.func @transform_11(%arg0: i32) -> (i32, i32) {
    %c0_i32 = arith.constant 0 : i32
    %c0_i32_0 = arith.constant 0 : i32
    %c0_i32_1 = arith.constant 0 : i32
    return %c0_i32, %c0_i32_0 : i32, i32
  }
  func.func @transform_12(%arg0: i32) -> (i32, i32, i32) {
    %c0_i32 = arith.constant 0 : i32
    %c0_i32_0 = arith.constant 0 : i32
    %c0_i32_1 = arith.constant 0 : i32
    return %arg0, %c0_i32, %c0_i32_0 : i32, i32, i32
  }
}

</mosaic_0001>

<bundles_post_ra>
// kernel: tpu_custom_call.1
= control target key start
LH: loop header
LB: loop body
LE: loop exit
PB: predicated region body
PF: predicated region fallthrough
CT: control target
= control target key end

     0   :  { %s2806_s0 = inlined_call_operand.vmem [shape: f32[2,8,32], index: 0, kind: input, shape index: {}]   ;;  %s2807_s1 = inlined_call_operand.vmem [shape: f32[1,32], index: 1, kind: input, shape index: {}]   ;;  %s2808_s2 = inlined_call_operand.vmem [shape: f32[1,32], index: 2, kind: input, shape index: {}]   ;;  %s2809_s3 = inlined_call_operand.vmem [shape: bf16[32,96], index: 3, kind: input, shape index: {}]   ;;  %s2810_s4 = inlined_call_operand.vmem [shape: bf16[32,32], index: 4, kind: input, shape index: {}]   ;;  %s2811_s5 = inlined_call_operand.vmem [shape: f32[1,32], index: 5, kind: input, shape index: {}]   ;;  %s2812_s6 = inlined_call_operand.vmem [shape: f32[1,32], index: 6, kind: input, shape index: {}]   ;;  %s2813_s7 = inlined_call_operand.vmem [shape: f32[1,32], index: 7, kind: input, shape index: {}]   ;;  %s2814_s8 = inlined_call_operand.vmem [shape: bf16[32,128], index: 8, kind: input, shape index: {}]   ;;  %s2815_s9 = inlined_call_operand.vmem [shape: f32[1,128], index: 9, kind: input, shape index: {}]   ;;  %s2816_s10 = inlined_call_operand.vmem [shape: bf16[128,32], index: 10, kind: input, shape index: {}]   ;;  %s2817_s11 = inlined_call_operand.vmem [shape: f32[1,32], index: 11, kind: input, shape index: {}]   ;;  %s2818_s12 = inlined_call_operand.hbm [shape: f32[2,8,32], index: 12, kind: output, shape index: {}]  }
   0x1   :  { %2819 = sst [smem:[#allocation7_spill]] %s2806_s0 }
   0x2   :  { %2820 = sst [smem:[#allocation8_spill]] %s2807_s1 }
   0x3   :  { %17 = vsyncpa [#allocation5], 0 }
   0x4   :  { %19 = vsyncpa [#allocation5 + $0x1], 0  ;;  %s2420_s21 = smov 0   ;;  %s2422_s22 = smov 0  }
   0x5   :  { %s2424_s23 = smov 0   ;;  %s2426_s24 = smov 0  }
   0x6 LB: > { %s2441_s25 = sadd.s32 4294967295, %s2320_s24   ;;  %s1861_s26 = sadd.s32 4294967294, %s2320_s24   ;;  %s2320_s24 = sphi %s2426_s24, %s2828_s24   ;;  %s2316_s23 = sphi %s2424_s23, %s2827_s23   ;;  %s2312_s22 = sphi %s2422_s22, %s2826_s22   ;;  %s2308_s21 = sphi %s2420_s21, %s2825_s21  }
   0x7   : > { %s2445_s27 = sadd.s32 1, %s2320_s24   ;;  %s289_s28 = sadd.s32 1, %s2316_s23 }
   0x8   : > { %s286_s29 = ssub.s32 %s2320_s24, %s2445_s27  ;;  %p299_p0 = scmp.ne.s32.totalorder %s2316_s23, %s2312_s22 }
   0x9   : > { %p287_p1 = scmp.eq.s32.totalorder %s286_s29, 0  ;;  %p300_p2 = scmp.eq.s32.totalorder %s2441_s25, 1 }
   0xa   : > { %p305_p3 = scmp.ne.s32.totalorder %s2312_s22, %s2308_s21  ;;  %p306_p4 = scmp.eq.s32.totalorder %s1861_s26, 1 }
   0xb   : > { %s2456_s30 = scalar_select %p287_p1, %s2316_s23, %s289_s28  }
   0xc   : > { %p2458_p5 = por %p300_p2, %p299_p0  ;;  %p2462_p6 = por %p306_p4, %p305_p3 }
   0xd   : > { %p1864_p7 = scmp.ge.s32.totalorder %s2320_s24, 1  ;;  %p364_p8 = scmp.lt.s32.totalorder %s2320_s24, 3 }
   0xf   : > { %p365_p9 = pnand %p1864_p7, %p364_p8 }
  0x10   : > { %p405_p10 = scmp.lt.s32.totalorder (!%p365_p9), %s2441_s25, 1  ;;  %vm413_vm0 = vcmask (!%p365_p9), 261120   ;;  %s2823_s0 = sld [smem:[#allocation7_spill]] (!%p365_p9)  ;;  %v2196_v7 = vld [vmem:[%s2809_s3] sm:$0xff] (!%p365_p9)   ;;  %v2322_v8 = vmov (!%p365_p9), 0.0   ;;  %vm2323_vm1 = vmmov (!%p365_p9), 0  }
  0x11   : > { %368 = sbr.rel (%p365_p9) target bundleno = 2688 (0xa80), region = 68  ;;  %1985 = vmatprep.subr.bf16.mxu0 (!%p365_p9), %v2322_v8  ;;  %1989 = vmatprep.mubr.msk.bf16.mxu0 (!%p365_p9), %vm2323_vm1, %v2322_v8  ;;  %v2197_v9 = vld [vmem:[%s2809_s3 + $0x8] sm:$0xff] (!%p365_p9)   ;;  %s2824_s1 = sld [smem:[#allocation8_spill]] (!%p365_p9)  ;;  %v1868_v16 = vld [vmem:[%s2808_s2] ss:$0 sm:$0xff] (!%p365_p9)  ;;  %vm503_vm2 = vcmask (!%p365_p9), 781312  }
  0x12   : > { %1986 = vmatpush3.bf16.msra.mxu0 (!%p365_p9), %v2196_v7  ;;  %2005 = vmatprep.subr.bf16.mxu1 (!%p365_p9), %v2322_v8  ;;  %s2325_s20 = smov (!%p365_p9), 96   ;;  %s2326_s26 = smov (!%p365_p9), 76   ;;  %vm511_vm3 = vcmask (!%p365_p9), 31744   ;;  %vm558_vm4 = vcmask (!%p365_p9), 64512   ;;  %vm576_vm5 = vcmask (!%p365_p9), 1043456   ;;  %vm621_vm6 = vcmask (!%p365_p9), 27648  }
  0x13   : > { %1987 = vmatprep.subr.bf16.mxu0 (!%p365_p9), %v2322_v8  ;;  %2007 = vmatprep.mubr.msk.bf16.mxu1 (!%p365_p9), %vm2323_vm1, %v2322_v8  ;;  %s2327_s28 = smov (!%p365_p9), 92   ;;  %s2328_s29 = smov (!%p365_p9), 72   ;;  %vm744_vm7 = vcmask (!%p365_p9), 60448   ;;  %vm867_vm8 = vcmask (!%p365_p9), 93248   ;;  %vm990_vm9 = vcmask (!%p365_p9), 126048   ;;  %vm1113_vm10 = vcmask (!%p365_p9), 158848  }
  0x14   : > { %s2331_s17 = smov (!%p365_p9), 120   ;;  %s2332_s18 = smov (!%p365_p9), 84   ;;  %vm1236_vm11 = vcmask (!%p365_p9), 191648   ;;  %vm1359_vm12 = vcmask (!%p365_p9), 224448   ;;  %vm1482_vm13 = vcmask (!%p365_p9), 257248  }
  0x16   : > { %1988 = vmatpush3.bf16.msra.mxu0 (!%p365_p9), %v2197_v9 }
  0x17   : > { %1993 = vmatprep.subr.bf16.mxu0 (!%p365_p9), %v2322_v8  ;;  %v1867_v14 = vld [vmem:[%s2824_s1] ss:$0 sm:$0xff] (!%p365_p9) }
  0x18   : > { %s406_s15 = scalar_select %p405_p10, %s2441_s25, 1 }
  0x1a   : > { %s1866_s16 = sshll.u32 %s406_s15, 3  ;;  %s2329_s15 = smov 88  }
  0x1b   : > { %s408_s19 = scalar_lea.vmem %s2823_s0, %s1866_s16  ;;  %s2330_s16 = smov 68  }
  0x1c   : > { %v2473_v0 = vld [vmem:[%s408_s19] sm:$0xff]  ;;  %s2324_s19 = smov 124  }
  0x1d   : > { %v414_v1 = vsel %vm413_vm0, %v2473_v0, 0.0 }
  0x1e   : > { %415 = vadd.xlane.f32.xlu0 %v414_v1 }
  0xab   : > { %v416_v2 = vpop.xlane.xlu0 %415 }
  0xac   : > { %v418_v3 = vmul.f32 0.03125, %v416_v2 }
  0xae   : > { %v419_v4 = vsub.f32 %v2473_v0, %v418_v3 }
  0xb0   : > { %v420_v5 = vmul.f32 %v419_v4, %v419_v4 }
  0xb2   : > { %v421_v6 = vsel %vm413_vm0, %v420_v5, 0.0 }
  0xb3   : > { %422 = vadd.xlane.f32.xlu0 %v421_v6 }
 0x140   : > { %v423_v10 = vpop.xlane.xlu0 %422 }
 0x141   : > { %v424_v11 = vmul.f32 0.03125, %v423_v10 }
 0x143   : > { %v425_v12 = vadd.f32 1e-05, %v424_v11 }
 0x145   : > { %2218 = vrsqrt.f32 %v425_v12 }
 0x14f   : > { %v2219_v13 = vpop.eup %2218 }
 0x150   : > { %v427_v15 = vmul.f32 %v2219_v13, %v419_v4 }
 0x152   : > { %v434_v17 = vmul.f32 %v1867_v14, %v427_v15 }
 0x154   : > { %v441_v18 = vadd.f32 %v1868_v16, %v434_v17 }
 0x156   : > { %v442_v19 = vpack.c.bf16 %v441_v18, %v441_v18 }
 0x158   : > { %1990 = vmatmul.mubr.msk.bf16.vlgmr.msra.gmra.mrb[0].mxu0 %vm413_vm0, %v442_v19 }
 0x159   : > { %1995 = vmatprep.mubr.msk.bf16.mxu0 %vm2323_vm1, %v2322_v8 }
 0x22b   : > { %v496_v20 = vpop.f32.mrb[0].mxu0 }
 0x22c   : > { %v502_v21 = vpack.c.bf16 %v496_v20, %v496_v20  ;;  %v1991_v22 = vpop.f32.mrb[1].mxu0 }
 0x22d   : > { %v499_v23 = vpop.f32.mrb[2].mxu0 }
 0x22e   : > { %504 = vst.msk [vmem:[#allocation2] sm:$0xf] %vm503_vm2, %v502_v21  ;;  %v1992_v24 = vpop.f32.mrb[3].mxu0 }
 0x235   : > { %v2502_v25 = vld [vmem:[#allocation2] ss:$0 sps:$4 sm:$0xff]  }
 0x236   : > { %v505_v26 = vld [vmem:[#allocation2] sm:$0xf]  ;;  %627 = vrot.lane.b32.xlu0 %v2502_v25, %s2324_s19  ;;  %s2333_s19 = smov 116  }
 0x237   : > { %v2504_v27 = vcombine.low %v505_v26, %v505_v26  ;;  %v2508_v28 = vld [vmem:[#allocation2] ss:$0 sps:$4 sm:$0xff]  }
 0x238   : > { %v2512_v29 = vld [vmem:[#allocation2] ss:$0 sps:$4 sm:$0xff]  }
 0x239   : > { %509 = vrot.lane.b32.xlu1 %v2504_v27, %s2325_s20  ;;  %v2514_v30 = vld [vmem:[#allocation2] ss:$0 sps:$4 sm:$0xff]   ;;  %s2334_s20 = smov 80  }
 0x23a   : > { %1121 = vrot.lane.b32.xlu0 %v2508_v28, %s2326_s26  ;;  %v2518_v31 = vld [vmem:[#allocation2] ss:$0 sps:$4 sm:$0xff]   ;;  %s2335_s26 = smov 112  }
 0x23b   : > { %v2522_v32 = vld [vmem:[#allocation2] ss:$0 sps:$4 sm:$0xff]  }
 0x23c   : > { %v2526_v33 = vld [vmem:[#allocation2] ss:$0 sps:$4 sm:$0xff]  }
 0x23d   : > { %629 = vrot.lane.b32.xlu1 %v2502_v25, %s2327_s28  ;;  %s2336_s28 = smov 108  }
 0x23e   : > { %1244 = vrot.lane.b32.xlu0 %v2512_v29, %s2328_s29  ;;  %s2337_s29 = smov 104  }
 0x241   : > { %752 = vrot.lane.b32.xlu1 %v2514_v30, %s2329_s15  ;;  %s2338_s15 = smov 100  }
 0x242   : > { %1367 = vrot.lane.b32.xlu0 %v2518_v31, %s2330_s16  ;;  %s2339_s16 = smov 60  }
 0x245   : > { %750 = vrot.lane.b32.xlu1 %v2514_v30, %s2331_s17  ;;  %s2340_s17 = smov 64  }
 0x249   : > { %875 = vrot.lane.b32.xlu1 %v2522_v32, %s2332_s18  ;;  %s2341_s18 = smov 56  }
 0x24d   : > { %873 = vrot.lane.b32.xlu1 %v2522_v32, %s2333_s19  ;;  %s2342_s19 = smov 52  }
 0x251   : > { %998 = vrot.lane.b32.xlu1 %v2526_v33, %s2334_s20  ;;  %s2343_s20 = smov 44  }
 0x255   : > { %996 = vrot.lane.b32.xlu1 %v2526_v33, %s2335_s26  ;;  %s2344_s26 = smov 40  }
 0x259   : > { %1119 = vrot.lane.b32.xlu1 %v2508_v28, %s2336_s28  ;;  %s2345_s28 = smov 36  }
 0x25d   : > { %1242 = vrot.lane.b32.xlu1 %v2512_v29, %s2337_s29  ;;  %s2346_s29 = smov 48  }
 0x261   : > { %1365 = vrot.lane.b32.xlu1 %v2518_v31, %s2338_s15  ;;  %s2347_s15 = smov 4  }
 0x2a8   : > { %v628_v39 = vpop.permute.xlu0 %627 }
 0x2ab   : > { %v510_v34 = vpop.permute.xlu1 %509 }
 0x2ac   : > { %v516_v35 = vsel %vm511_vm3, %v510_v34, 0  ;;  %v1122_v47 = vpop.permute.xlu0 %1121 }
 0x2ad   : > { %1994 = vmatpush3.bf16.xpose.msra.mxu0 %v516_v35  ;;  %v1127_v49 = vsel %vm511_vm3, %v1122_v47, 0 }
 0x2ae   : > { %1999 = vmatprep.subr.bf16.mxu0 %v2322_v8 }
 0x2af   : > { %v630_v36 = vpop.permute.xlu1 %629 }
 0x2b0   : > { %v635_v37 = vsel %vm511_vm3, %v630_v36, 0  ;;  %v1245_v50 = vpop.permute.xlu0 %1244 }
 0x2b1   : > { %2006 = vmatpush3.bf16.xpose.msra.mxu1 %v635_v37  ;;  %v1250_v52 = vsel %vm511_vm3, %v1245_v50, 0 }
 0x2b2   : > { %2017 = vmatprep.subr.bf16.mxu1 %v2322_v8 }
 0x2b3   : > { %v753_v38 = vpop.permute.xlu1 %752 }
 0x2b4   : > { %1996 = vmatmul.mubr.msk.bf16.vlgmr.msra.gmra.mrb[4].mxu0 %vm511_vm3, %v505_v26  ;;  %v758_v41 = vsel %vm511_vm3, %v753_v38, 0  ;;  %v1368_v53 = vpop.permute.xlu0 %1367 }
 0x2b5   : > { %2001 = vmatprep.mubr.msk.bf16.mxu0 %vm2323_vm1, %v2322_v8  ;;  %v1373_v55 = vsel %vm511_vm3, %v1368_v53, 0 }
 0x2b7   : > { %v751_v40 = vpop.permute.xlu1 %750 }
 0x2b8   : > { %2008 = vmatmul.mubr.msk.bf16.vlgmr.msra.gmra.mrb[0].mxu1 %vm511_vm3, %v628_v39 }
 0x2b9   : > { %2018 = vmatpush3.bf16.xpose.msra.mxu1 %v758_v41  ;;  %2019 = vmatprep.mubr.msk.bf16.mxu1 %vm2323_vm1, %v2322_v8 }
 0x2ba   : > { %2029 = vmatprep.subr.bf16.mxu1 %v2322_v8 }
 0x2bb   : > { %v876_v42 = vpop.permute.xlu1 %875 }
 0x2bc   : > { %v881_v44 = vsel %vm511_vm3, %v876_v42, 0 }
 0x2bf   : > { %v874_v43 = vpop.permute.xlu1 %873 }
 0x2c0   : > { %2020 = vmatmul.mubr.msk.bf16.vlgmr.msra.gmra.mrb[4].mxu1 %vm511_vm3, %v751_v40 }
 0x2c1   : > { %2030 = vmatpush3.bf16.xpose.msra.mxu1 %v881_v44  ;;  %2031 = vmatprep.mubr.msk.bf16.mxu1 %vm2323_vm1, %v2322_v8 }
 0x2c2   : > { %2041 = vmatprep.subr.bf16.mxu1 %v2322_v8 }
 0x2c3   : > { %v999_v45 = vpop.permute.xlu1 %998 }
 0x2c4   : > { %v1004_v46 = vsel %vm511_vm3, %v999_v45, 0 }
 0x2c7   : > { %v997_v48 = vpop.permute.xlu1 %996 }
 0x2c8   : > { %2032 = vmatmul.mubr.msk.bf16.vlgmr.msra.gmra.mrb[8].mxu1 %vm511_vm3, %v874_v43 }
 0x2c9   : > { %2042 = vmatpush3.bf16.xpose.msra.mxu1 %v1004_v46  ;;  %2043 = vmatprep.mubr.msk.bf16.mxu1 %vm2323_vm1, %v2322_v8 }
 0x2ca   : > { %2053 = vmatprep.subr.bf16.mxu1 %v2322_v8 }
 0x2cb   : > { %v1120_v51 = vpop.permute.xlu1 %1119 }
 0x2cf   : > { %v1243_v54 = vpop.permute.xlu1 %1242 }
 0x2d0   : > { %2044 = vmatmul.mubr.msk.bf16.vlgmr.msra.gmra.mrb[12].mxu1 %vm511_vm3, %v997_v48 }
 0x2d1   : > { %2054 = vmatpush3.bf16.xpose.msra.mxu1 %v1127_v49  ;;  %2055 = vmatprep.mubr.msk.bf16.mxu1 %vm2323_vm1, %v2322_v8 }
 0x2d2   : > { %2065 = vmatprep.subr.bf16.mxu1 %v2322_v8 }
 0x2d3   : > { %v1366_v56 = vpop.permute.xlu1 %1365 }
 0x2d8   : > { %2056 = vmatmul.mubr.msk.bf16.vlgmr.msra.gmra.mrb[16].mxu1 %vm511_vm3, %v1120_v51 }
 0x2d9   : > { %2066 = vmatpush3.bf16.xpose.msra.mxu1 %v1250_v52  ;;  %2067 = vmatprep.mubr.msk.bf16.mxu1 %vm2323_vm1, %v2322_v8 }
 0x2da   : > { %2077 = vmatprep.subr.bf16.mxu1 %v2322_v8 }
 0x2e0   : > { %2068 = vmatmul.mubr.msk.bf16.vlgmr.msra.gmra.mrb[20].mxu1 %vm511_vm3, %v1243_v54 }
 0x2e1   : > { %2078 = vmatpush3.bf16.xpose.msra.mxu1 %v1373_v55  ;;  %2079 = vmatprep.mubr.msk.bf16.mxu1 %vm2323_vm1, %v2322_v8 }
 0x2e2   : > { %2089 = vmatprep.subr.bf16.mxu1 %v2322_v8 }
 0x2e8   : > { %2080 = vmatmul.mubr.msk.bf16.vlgmr.msra.gmra.mrb[24].mxu1 %vm511_vm3, %v1366_v56 }
 0x2e9   : > { %2093 = vmatprep.mubr.msk.bf16.mxu1 %vm2323_vm1, %v2322_v8 }
 0x387   : > { %v552_v57 = vpop.f32.mrb[4].mxu0 }
 0x388   : > { %v1997_v58 = vpop.f32.mrb[5].mxu0  ;;  %v559_v59 = vsel %vm558_vm4, %v552_v57, -inf }
 0x389   : > { %560 = vmax.xlane.f32.xlu0 %v559_v59  ;;  %v555_v60 = vpop.f32.mrb[6].mxu0 }
 0x38a   : > { %v1998_v61 = vpop.f32.mrb[7].mxu0 }
 0x38b   : > { %v671_v62 = vpop.f32.mrb[0].mxu1 }
 0x38c   : > { %v2009_v63 = vpop.f32.mrb[1].mxu1  ;;  %v677_v1 = vsel %vm558_vm4, %v671_v62, -inf }
 0x38d   : > { %678 = vmax.xlane.f32.xlu1 %v677_v1  ;;  %v674_v2 = vpop.f32.mrb[2].mxu1 }
 0x38e   : > { %v2010_v3 = vpop.f32.mrb[3].mxu1 }
 0x393   : > { %v794_v4 = vpop.f32.mrb[4].mxu1 }
 0x394   : > { %v2021_v5 = vpop.f32.mrb[5].mxu1  ;;  %v800_v6 = vsel %vm558_vm4, %v794_v4, -inf }
 0x395   : > { %v797_v7 = vpop.f32.mrb[6].mxu1  ;;  %801 = vmax.xlane.f32.xlu0 %v800_v6 }
 0x396   : > { %v2022_v9 = vpop.f32.mrb[7].mxu1 }
 0x39b   : > { %v2576_v10 = vpop.f32.mrb[8].mxu1 }
 0x39c   : > { %v2033_v11 = vpop.f32.mrb[9].mxu1  ;;  %v923_v12 = vsel %vm558_vm4, %v2576_v10, -inf }
 0x39d   : > { %v920_v13 = vpop.f32.mrb[10].mxu1  ;;  %924 = vmax.xlane.f32.xlu0 %v923_v12 }
 0x39e   : > { %v2034_v14 = vpop.f32.mrb[11].mxu1 }
 0x3a3   : > { %v2580_v15 = vpop.f32.mrb[12].mxu1 }
 0x3a4   : > { %v2045_v16 = vpop.f32.mrb[13].mxu1  ;;  %v1046_v17 = vsel %vm558_vm4, %v2580_v15, -inf }
 0x3a5   : > { %1047 = vmax.xlane.f32.xlu1 %v1046_v17  ;;  %v1043_v18 = vpop.f32.mrb[14].mxu1 }
 0x3a6   : > { %v2046_v19 = vpop.f32.mrb[15].mxu1 }
 0x3ab   : > { %v2584_v20 = vpop.f32.mrb[16].mxu1 }
 0x3ac   : > { %v2057_v21 = vpop.f32.mrb[17].mxu1  ;;  %v1169_v22 = vsel %vm558_vm4, %v2584_v20, -inf }
 0x3ad   : > { %v1166_v23 = vpop.f32.mrb[18].mxu1  ;;  %1170 = vmax.xlane.f32.xlu0 %v1169_v22 }
 0x3ae   : > { %v2058_v24 = vpop.f32.mrb[19].mxu1 }
 0x3b3   : > { %v1286_v26 = vpop.f32.mrb[20].mxu1 }
 0x3b4   : > { %v2069_v34 = vpop.f32.mrb[21].mxu1  ;;  %v1292_v35 = vsel %vm558_vm4, %v1286_v26, -inf }
 0x3b5   : > { %1293 = vmax.xlane.f32.xlu1 %v1292_v35  ;;  %v1289_v36 = vpop.f32.mrb[22].mxu1 }
 0x3b6   : > { %v2070_v37 = vpop.f32.mrb[23].mxu1 }
 0x3bb   : > { %v2589_v38 = vpop.f32.mrb[24].mxu1 }
 0x3bc   : > { %v2081_v39 = vpop.f32.mrb[25].mxu1  ;;  %v1415_v42 = vsel %vm558_vm4, %v2589_v38, -inf }
 0x3bd   : > { %v1412_v40 = vpop.f32.mrb[26].mxu1 }
 0x3be   : > { %v2082_v41 = vpop.f32.mrb[27].mxu1 }
 0x3c3   : > { %689 = vrot.lane.b32.xlu0 %v2502_v25, %s2339_s16  ;;  %s2348_s16 = smov 8  }
 0x3c6   : > { %571 = vrot.lane.b32.xlu1 %v2504_v27, %s2340_s17  ;;  %s2349_s17 = smov 12  }
 0x3e2   : > { %1416 = vmax.xlane.f32.xlu0 %v1415_v42 }
 0x416   : > { %v561_v43 = vpop.xlane.xlu0 %560 }
 0x417   : > { %v562_v44 = vsub.f32 %v552_v57, %v561_v43 }
 0x419   : > { %v563_v45 = vmul.f32 1.442695, %v562_v44 }
 0x41a   : > { %v679_v46 = vpop.xlane.xlu1 %678 }
 0x41b   : > { %2220 = vpow2.f32 %v563_v45  ;;  %v680_v47 = vsub.f32 %v671_v62, %v679_v46 }
 0x41d   : > { %v681_v48 = vmul.f32 1.442695, %v680_v47 }
 0x41f   : > { %2222 = vpow2.f32 %v681_v48 }
 0x422   : > { %v802_v49 = vpop.xlane.xlu0 %801 }
 0x423   : > { %v803_v50 = vsub.f32 %v794_v4, %v802_v49 }
 0x425   : > { %v2595_v51 = vpop.eup %2220  ;;  %v804_v25 = vmul.f32 1.442695, %v803_v50 }
 0x426   : > { %v565_v27 = vsel %vm558_vm4, %v2595_v51, 0.0 }
 0x427   : > { %2224 = vpow2.f32 %v804_v25  ;;  %566 = vadd.xlane.f32.xlu1 %v565_v27 }
 0x429   : > { %v2599_v52 = vpop.eup %2222 }
 0x42a   : > { %v683_v53 = vsel %vm558_vm4, %v2599_v52, 0.0  ;;  %v925_v59 = vpop.xlane.xlu0 %924 }
 0x42b   : > { %684 = vadd.xlane.f32.xlu0 %v683_v53  ;;  %v926_v61 = vsub.f32 %v2576_v10, %v925_v59 }
 0x42d   : > { %v927_v62 = vmul.f32 1.442695, %v926_v61 }
 0x42f   : > { %2226 = vpow2.f32 %v927_v62 }
 0x431   : > { %v2603_v54 = vpop.eup %2224 }
 0x432   : > { %v806_v55 = vsel %vm558_vm4, %v2603_v54, 0.0  ;;  %v1048_v56 = vpop.xlane.xlu1 %1047 }
 0x433   : > { %807 = vadd.xlane.f32.xlu1 %v806_v55  ;;  %v1049_v63 = vsub.f32 %v2580_v15, %v1048_v56 }
 0x435   : > { %v1050_v2 = vmul.f32 1.442695, %v1049_v63 }
 0x437   : > { %2228 = vpow2.f32 %v1050_v2 }
 0x439   : > { %v2614_v5 = vpop.eup %2226 }
 0x43a   : > { %v1171_v1 = vpop.xlane.xlu0 %1170  ;;  %v929_v6 = vsel %vm558_vm4, %v2614_v5, 0.0 }
 0x43e   : > { %v690_v14 = vpop.permute.xlu0 %689 }
 0x441   : > { %812 = vrot.lane.b32.xlu0 %v2514_v30, %s2341_s18  ;;  %v1172_v30 = vsub.f32 %v2584_v20, %v1171_v1  ;;  %v2618_v7 = vpop.eup %2228  ;;  %s2350_s18 = smov 16  }
 0x442   : > { %v1294_v57 = vpop.xlane.xlu1 %1293  ;;  %v1052_v10 = vsel %vm558_vm4, %v2618_v7, 0.0 }
 0x443   : > { %v1295_v3 = vsub.f32 %v1286_v26, %v1294_v57  ;;  %v695_v26 = vsel %vm576_vm5, %v690_v14, 0 }
 0x444   : > { %935 = vrot.lane.b32.xlu1 %v2522_v32, %s2342_s19  ;;  %v1173_v32 = vmul.f32 1.442695, %v1172_v30  ;;  %s2351_s19 = smov 20  }
 0x445   : > { %v1296_v4 = vmul.f32 1.442695, %v1295_v3 }
 0x446   : > { %v572_v58 = vpop.permute.xlu1 %571  ;;  %2230 = vpow2.f32 %v1173_v32 }
 0x447   : > { %v578_v60 = vsel %vm576_vm5, %v572_v58, 0  ;;  %2232 = vpow2.f32 %v1296_v4 }
 0x448   : > { %2000 = vmatpush3.bf16.msra.mxu0 %v578_v60 }
 0x449   : > { %2011 = vmatprep.subr.bf16.mxu0 %v2322_v8 }
 0x450   : > { %v2620_v9 = vpop.eup %2230 }
 0x451   : > { %v2624_v11 = vpop.eup %2232  ;;  %v1175_v13 = vsel %vm558_vm4, %v2620_v9, 0.0 }
 0x452   : > { %v1298_v12 = vsel %vm558_vm4, %v2624_v11, 0.0 }
 0x460   : > { %930 = vadd.xlane.f32.xlu0 %v929_v6 }
 0x464   : > { %1053 = vadd.xlane.f32.xlu0 %v1052_v10 }
 0x468   : > { %1299 = vadd.xlane.f32.xlu0 %v1298_v12  ;;  %1176 = vadd.xlane.f32.xlu1 %v1175_v13 }
 0x46f   : > { %v1417_v15 = vpop.xlane.xlu0 %1416 }
 0x470   : > { %v1418_v16 = vsub.f32 %v2589_v38, %v1417_v15 }
 0x472   : > { %v1419_v17 = vmul.f32 1.442695, %v1418_v16 }
 0x474   : > { %2234 = vpow2.f32 %v1419_v17 }
 0x479   : > { %1181 = vrot.lane.b32.xlu1 %v2508_v28, %s2343_s20  ;;  %s2354_s20 = smov [#allocation4]  }
 0x47d   : > { %1304 = vrot.lane.b32.xlu1 %v2512_v29, %s2344_s26  ;;  %s2262_s26 = sshll.u32 %s2354_s20, 4  ;;  %s2263_s26 = int_to_ptr.vmem [resolvable:$false] %s2262_s26 }
 0x47e   : > { %v2633_v18 = vpop.eup %2234  ;;  %s2264_s1 = scalar_lea.vmem %s2263_s26, 256 }
 0x47f   : > { %v1421_v19 = vsel %vm558_vm4, %v2633_v18, 0.0 }
 0x480   : > { %1422 = vadd.xlane.f32.xlu0 %v1421_v19 }
 0x481   : > { %1427 = vrot.lane.b32.xlu1 %v2518_v31, %s2345_s28  ;;  %s1925_s28 = sshll.u32 %s2441_s25, 7 }
 0x482   : > { %s2763_s0 = scalar_lea.hbm %s2818_s12, %s1925_s28 }
 0x496   : > { %1058 = vrot.lane.b32.xlu0 %v2526_v33, %s2346_s29 }
 0x4b4   : > { %v567_v20 = vpop.xlane.xlu1 %566 }
 0x4b5   : > { %2236 = vrcp.f32 %v567_v20 }
 0x4b8   : > { %v685_v21 = vpop.xlane.xlu0 %684 }
 0x4b9   : > { %2238 = vrcp.f32 %v685_v21 }
 0x4bc   : > { %v813_v33 = vpop.permute.xlu0 %812 }
 0x4bd   : > { %v818_v36 = vsel %vm576_vm5, %v813_v33, 0 }
 0x4bf   : > { %v2237_v28 = vpop.eup %2236 }
 0x4c0   : > { %v569_v22 = vmul.f32 %v2237_v28, %v2595_v51  ;;  %v808_v29 = vpop.xlane.xlu1 %807 }
 0x4c1   : > { %2240 = vrcp.f32 %v808_v29 }
 0x4c2   : > { %v570_v23 = vpack.c.bf16 %v569_v22, %v569_v22 }
 0x4c3   : > { %v2239_v24 = vpop.eup %2238 }
 0x4c4   : > { %2002 = vmatmul.mubr.msk.bf16.vlgmr.msra.gmra.mrb[8].mxu0 %vm558_vm4, %v570_v23  ;;  %v687_v31 = vmul.f32 %v2239_v24, %v2599_v52  ;;  %v936_v38 = vpop.permute.xlu1 %935 }
 0x4c5   : > { %2012 = vmatpush3.bf16.msra.mxu0 %v695_v26  ;;  %2013 = vmatprep.mubr.msk.bf16.mxu0 %vm2323_vm1, %v2322_v8  ;;  %v941_v40 = vsel %vm576_vm5, %v936_v38, 0 }
 0x4c6   : > { %2023 = vmatprep.subr.bf16.mxu0 %v2322_v8  ;;  %v688_v34 = vpack.c.bf16 %v687_v31, %v687_v31 }
 0x4cb   : > { %v2241_v35 = vpop.eup %2240 }
 0x4cc   : > { %2014 = vmatmul.mubr.msk.bf16.vlgmr.msra.gmra.mrb[12].mxu0 %vm558_vm4, %v688_v34  ;;  %v810_v37 = vmul.f32 %v2241_v35, %v2603_v54 }
 0x4cd   : > { %2024 = vmatpush3.bf16.msra.mxu0 %v818_v36  ;;  %2025 = vmatprep.mubr.msk.bf16.mxu0 %vm2323_vm1, %v2322_v8 }
 0x4ce   : > { %2035 = vmatprep.subr.bf16.mxu0 %v2322_v8  ;;  %v811_v39 = vpack.c.bf16 %v810_v37, %v810_v37  ;;  %v2206_v37 = vld [vmem:[%s2810_s4] sm:$0xff]  }
 0x4cf   : > { %2090 = vmatpush3.bf16.msra.mxu1 %v2206_v37 }
 0x4d0   : > { %2091 = vmatprep.subr.bf16.mxu1 %v2322_v8 }
 0x4d4   : > { %2026 = vmatmul.mubr.msk.bf16.vlgmr.msra.gmra.mrb[16].mxu0 %vm558_vm4, %v811_v39  ;;  %v2207_v39 = vld [vmem:[%s2810_s4 + $0x8] sm:$0xff]  }
 0x4d5   : > { %2036 = vmatpush3.bf16.msra.mxu0 %v941_v40  ;;  %2037 = vmatprep.mubr.msk.bf16.mxu0 %vm2323_vm1, %v2322_v8 }
 0x4d6   : > { %2047 = vmatprep.subr.bf16.mxu0 %v2322_v8  ;;  %2092 = vmatpush3.bf16.msra.mxu1 %v2207_v39 }
 0x4d7   : > { %2105 = vmatprep.subr.bf16.mxu1 %v2322_v8 }
 0x4ed   : > { %v931_v41 = vpop.xlane.xlu0 %930 }
 0x4ee   : > { %2242 = vrcp.f32 %v931_v41 }
 0x4f1   : > { %v1054_v45 = vpop.xlane.xlu0 %1053 }
 0x4f2   : > { %2244 = vrcp.f32 %v1054_v45 }
 0x4f5   : > { %v1177_v46 = vpop.xlane.xlu1 %1176  ;;  %v1300_v47 = vpop.xlane.xlu0 %1299 }
 0x4f6   : > { %2246 = vrcp.f32 %v1177_v46 }
 0x4f7   : > { %2248 = vrcp.f32 %v1300_v47 }
 0x4f8   : > { %v2243_v42 = vpop.eup %2242 }
 0x4f9   : > { %v933_v43 = vmul.f32 %v2243_v42, %v2614_v5  ;;  %v1182_v27 = vpop.permute.xlu1 %1181 }
 0x4fa   : > { %v1187_v54 = vsel %vm576_vm5, %v1182_v27, 0 }
 0x4fb   : > { %v934_v44 = vpack.c.bf16 %v933_v43, %v933_v43 }
 0x4fc   : > { %v2245_v48 = vpop.eup %2244 }
 0x4fd   : > { %2038 = vmatmul.mubr.msk.bf16.vlgmr.msra.gmra.mrb[20].mxu0 %vm558_vm4, %v934_v44  ;;  %v1056_v50 = vmul.f32 %v2245_v48, %v2618_v7  ;;  %v1305_v56 = vpop.permute.xlu1 %1304 }
 0x4fe   : > { %2049 = vmatprep.mubr.msk.bf16.mxu0 %vm2323_vm1, %v2322_v8  ;;  %v1310_v59 = vsel %vm576_vm5, %v1305_v56, 0 }
 0x4ff   : > { %v1057_v52 = vpack.c.bf16 %v1056_v50, %v1056_v50 }
 0x500   : > { %v2247_v53 = vpop.eup %2246 }
 0x501   : > { %v1179_v55 = vmul.f32 %v2247_v53, %v2620_v9  ;;  %v2249_v58 = vpop.eup %2248  ;;  %v1428_v61 = vpop.permute.xlu1 %1427 }
 0x502   : > { %v1302_v60 = vmul.f32 %v2249_v58, %v2624_v11  ;;  %v1433_v1 = vsel %vm576_vm5, %v1428_v61, 0 }
 0x503   : > { %v1180_v57 = vpack.c.bf16 %v1179_v55, %v1179_v55  ;;  %v1903_v55 = vld [vmem:[%s2811_s5] ss:$0 sm:$0xff] }
 0x504   : > { %v1303_v62 = vpack.c.bf16 %v1302_v60, %v1302_v60 }
 0x50d   : > { %v1423_v49 = vpop.xlane.xlu0 %1422 }
 0x50e   : > { %2250 = vrcp.f32 %v1423_v49 }
 0x511   : > { %v1059_v51 = vpop.permute.xlu0 %1058 }
 0x512   : > { %v1064_v25 = vsel %vm576_vm5, %v1059_v51, 0 }
 0x513   : > { %2048 = vmatpush3.bf16.msra.mxu0 %v1064_v25 }
 0x514   : > { %2059 = vmatprep.subr.bf16.mxu0 %v2322_v8 }
 0x516   : > { %2050 = vmatmul.mubr.msk.bf16.vlgmr.msra.gmra.mrb[24].mxu0 %vm558_vm4, %v1057_v52 }
 0x517   : > { %2060 = vmatpush3.bf16.msra.mxu0 %v1187_v54  ;;  %2061 = vmatprep.mubr.msk.bf16.mxu0 %vm2323_vm1, %v2322_v8 }
 0x518   : > { %2071 = vmatprep.subr.bf16.mxu0 %v2322_v8  ;;  %v2251_v63 = vpop.eup %2250 }
 0x519   : > { %v1425_v30 = vmul.f32 %v2251_v63, %v2633_v18 }
 0x51b   : > { %v1426_v2 = vpack.c.bf16 %v1425_v30, %v1425_v30 }
 0x51e   : > { %2062 = vmatmul.mubr.msk.bf16.vlgmr.msra.gmra.mrb[28].mxu0 %vm558_vm4, %v1180_v57 }
 0x51f   : > { %2072 = vmatpush3.bf16.msra.mxu0 %v1310_v59  ;;  %2073 = vmatprep.mubr.msk.bf16.mxu0 %vm2323_vm1, %v2322_v8 }
 0x520   : > { %2083 = vmatprep.subr.bf16.mxu0 %v2322_v8 }
 0x526   : > { %2074 = vmatmul.mubr.msk.bf16.vlgmr.msra.gmra.mrb[32].mxu0 %vm558_vm4, %v1303_v62 }
 0x527   : > { %2084 = vmatpush3.bf16.msra.mxu0 %v1433_v1  ;;  %2085 = vmatprep.mubr.msk.bf16.mxu0 %vm2323_vm1, %v2322_v8 }
 0x528   : > { %2097 = vmatprep.subr.bf16.mxu0 %v2322_v8 }
 0x52e   : > { %2086 = vmatmul.mubr.msk.bf16.vlgmr.msra.gmra.mrb[36].mxu0 %vm558_vm4, %v1426_v2 }
 0x52f   : > { %2101 = vmatprep.mubr.msk.bf16.mxu0 %vm2323_vm1, %v2322_v8 }
 0x597   : > { %v614_v3 = vpop.f32.mrb[8].mxu0 }
 0x598   : > { %v620_v32 = vpack.c.bf16 %v614_v3, %v614_v3  ;;  %v2003_v4 = vpop.f32.mrb[9].mxu0 }
 0x599   : > { %v617_v5 = vpop.f32.mrb[10].mxu0 }
 0x59a   : > { %622 = vst.msk [vmem:[#allocation3] sm:$0xf] %vm621_vm6, %v620_v32  ;;  %v2004_v6 = vpop.f32.mrb[11].mxu0  ;;  %v2208_v32 = vld [vmem:[%s2814_s8] sm:$0xff]  }
 0x59b   : > { %2098 = vmatpush3.bf16.msra.mxu0 %v2208_v32 }
 0x59c   : > { %2099 = vmatprep.subr.bf16.mxu0 %v2322_v8 }
 0x59f   : > { %v731_v7 = vpop.f32.mrb[12].mxu0 }
 0x5a0   : > { %v1928_v9 = vpack.c.bf16 %v731_v7, %v731_v7  ;;  %v2015_v10 = vpop.f32.mrb[13].mxu0 }
 0x5a1   : > { %v734_v11 = vpop.f32.mrb[14].mxu0 }
 0x5a2   : > { %741 = vrot.lane.b32.xlu1 %v1928_v9, %s2347_s15  ;;  %v2016_v12 = vpop.f32.mrb[15].mxu0  ;;  %s2352_s15 = smov 24   ;;  %v1907_v9 = vld [vmem:[%s2812_s6] ss:$0 sm:$0xff] }
 0x5a3   : > { %v1908_v11 = vld [vmem:[%s2813_s7] ss:$0 sm:$0xff] }
 0x5a7   : > { %v854_v13 = vpop.f32.mrb[16].mxu0 }
 0x5a8   : > { %v1929_v14 = vpack.c.bf16 %v854_v13, %v854_v13  ;;  %v2027_v15 = vpop.f32.mrb[17].mxu0 }
 0x5a9   : > { %v857_v16 = vpop.f32.mrb[18].mxu0  ;;  %v2210_v15 = vld [vmem:[%s2816_s10] sm:$0xff]  }
 0x5aa   : > { %864 = vrot.lane.b32.xlu1 %v1929_v14, %s2348_s16  ;;  %v2028_v17 = vpop.f32.mrb[19].mxu0  ;;  %s2353_s16 = smov 28   ;;  %v2211_v16 = vld [vmem:[%s2816_s10 + $0x8] sm:$0xff]  }
 0x5ab   : > { %v2212_v17 = vld [vmem:[%s2816_s10 + $0x10] sm:$0xff]  }
 0x5d0   : > { %v977_v18 = vpop.f32.mrb[20].mxu0 }
 0x5d1   : > { %v1930_v19 = vpack.c.bf16 %v977_v18, %v977_v18  ;;  %v2039_v20 = vpop.f32.mrb[21].mxu0  ;;  %v2213_v18 = vld [vmem:[%s2816_s10 + $0x18] sm:$0xff]  }
 0x5d2   : > { %v980_v21 = vpop.f32.mrb[22].mxu0  ;;  %v2215_v20 = vld [vmem:[%s2816_s10 + $0x28] sm:$0xff]  }
 0x5d3   : > { %987 = vrot.lane.b32.xlu0 %v1930_v19, %s2349_s17  ;;  %v2040_v28 = vpop.f32.mrb[23].mxu0  ;;  %v2214_v19 = vld [vmem:[%s2816_s10 + $0x20] sm:$0xff]   ;;  %v2216_v21 = vld [vmem:[%s2816_s10 + $0x30] sm:$0xff]  }
 0x5d4   : > { %v2217_v28 = vld [vmem:[%s2816_s10 + $0x38] sm:$0xff]  }
 0x5e9   : > { %v1100_v22 = vpop.f32.mrb[24].mxu0 }
 0x5ea   : > { %v1931_v29 = vpack.c.bf16 %v1100_v22, %v1100_v22  ;;  %v2051_v23 = vpop.f32.mrb[25].mxu0  ;;  %v1909_v22 = vld [vmem:[%s2815_s9] ss:$0 sm:$0xff] }
 0x5eb   : > { %v1103_v24 = vpop.f32.mrb[26].mxu0 }
 0x5ec   : > { %1110 = vrot.lane.b32.xlu1 %v1931_v29, %s2350_s18  ;;  %v2052_v26 = vpop.f32.mrb[27].mxu0  ;;  %s402_s18 = sand.u32 1, %s2312_s22  }
 0x5ed   : > { %s1789_s25 = scalar_lea.sflag [#allocation5], %s402_s18 }
 0x5f1   : > { %v1223_v31 = vpop.f32.mrb[28].mxu0 }
 0x5f2   : > { %v1932_v33 = vpack.c.bf16 %v1223_v31, %v1223_v31  ;;  %v2063_v34 = vpop.f32.mrb[29].mxu0 }
 0x5f3   : > { %v1226_v35 = vpop.f32.mrb[30].mxu0 }
 0x5f4   : > { %1233 = vrot.lane.b32.xlu0 %v1932_v33, %s2351_s19  ;;  %v2064_v36 = vpop.f32.mrb[31].mxu0  ;;  %s1865_s19 = sshll.u32 %s402_s18, 3 }
 0x5f5   : > { %s404_s29 = scalar_lea.vmem [#allocation4], %s1865_s19 }
 0x5f9   : > { %v1346_v38 = vpop.f32.mrb[32].mxu0 }
 0x5fa   : > { %v1933_v40 = vpack.c.bf16 %v1346_v38, %v1346_v38  ;;  %v2075_v41 = vpop.f32.mrb[33].mxu0 }
 0x5fb   : > { %v1349_v42 = vpop.f32.mrb[34].mxu0 }
 0x5fc   : > { %1356 = vrot.lane.b32.xlu1 %v1933_v40, %s2352_s15  ;;  %v2076_v43 = vpop.f32.mrb[35].mxu0  ;;  %s1802_s15 = sshll.u32 %s404_s29, 4  ;;  %s2765_s15 = int_to_ptr.vmem [resolvable:$true] %s1802_s15 }
 0x5fd   : > { %s2258_s19 = scalar_lea.vmem %s2765_s15, 128  ;;  %p2265_p0 = scmp.lt.s32.totalorder %s2765_s15, %s2263_s26 }
 0x5fe   : > { %p2259_p11 = scmp.ne.s32.totalorder %s2765_s15, %s2258_s19  ;;  %p2266_p1 = scmp.lt.s32.totalorder %s2264_s1, %s2258_s19 }
 0x600   : > { %p2260_p12 = pnand %p2259_p11, %p2458_p5  ;;  %p2267_p2 = por %p2266_p1, %p2265_p0 }
 0x601   : > { %v1469_v44 = vpop.f32.mrb[36].mxu0 }
 0x602   : > { %v1934_v45 = vpack.c.bf16 %v1469_v44, %v1469_v44  ;;  %v2087_v46 = vpop.f32.mrb[37].mxu0  ;;  %p2261_p13 = pneg %p2260_p12 }
 0x603   : > { %v1472_v47 = vpop.f32.mrb[38].mxu0 }
 0x604   : > { %1479 = vrot.lane.b32.xlu0 %v1934_v45, %s2353_s16  ;;  %v2088_v48 = vpop.f32.mrb[39].mxu0  ;;  %p2268_p3 = pnand %p2267_p2, %p2261_p13 }
 0x614   : > { %v742_v49 = vpop.permute.xlu1 %741 }
 0x615   : > { %745 = vst.msk [vmem:[#allocation3] sm:$0xf] %vm744_vm7, %v742_v49 }
 0x61c   : > { %v865_v50 = vpop.permute.xlu1 %864 }
 0x61d   : > { %868 = vst.msk [vmem:[#allocation3] sm:$0xf] %vm867_vm8, %v865_v50 }
 0x645   : > { %v988_v51 = vpop.permute.xlu0 %987 }
 0x646   : > { %991 = vst.msk [vmem:[#allocation3] sm:$0xf] %vm990_vm9, %v988_v51 }
 0x65e   : > { %v1111_v25 = vpop.permute.xlu1 %1110 }
 0x65f   : > { %1114 = vst.msk [vmem:[#allocation3] sm:$0xf] %vm1113_vm10, %v1111_v25 }
 0x666   : > { %v1234_v27 = vpop.permute.xlu0 %1233 }
 0x667   : > { %1237 = vst.msk [vmem:[#allocation3] sm:$0xf] %vm1236_vm11, %v1234_v27 }
 0x66e   : > { %v1357_v52 = vpop.permute.xlu1 %1356 }
 0x66f   : > { %1360 = vst.msk [vmem:[#allocation3] sm:$0xf] %vm1359_vm12, %v1357_v52 }
 0x676   : > { %v1480_v53 = vpop.permute.xlu0 %1479 }
 0x677   : > { %1483 = vst.msk [vmem:[#allocation3] sm:$0xf] %vm1482_vm13, %v1480_v53 }
 0x67e   : > { %v1484_v54 = vld [vmem:[#allocation3] sm:$0xf] }
 0x67f   : > { %2094 = vmatmul.mubr.msk.bf16.vlgmr.msra.gmra.mrb[28].mxu1 %vm413_vm0, %v1484_v54 }
 0x680   : > { %2121 = vmatprep.mubr.msk.bf16.mxu1 %vm2323_vm1, %v2322_v8  ;;  %2106 = vmatpush3.bf16.msra.mxu1 %v2210_v15 }
 0x681   : > { %2107 = vmatprep.subr.bf16.mxu1 %v2322_v8 }
 0x684   : > { %2108 = vmatpush3.bf16.msra.mxu1 %v2211_v16 }
 0x685   : > { %2109 = vmatprep.subr.bf16.mxu1 %v2322_v8 }
 0x688   : > { %2110 = vmatpush3.bf16.msra.mxu1 %v2212_v17 }
 0x689   : > { %2111 = vmatprep.subr.bf16.mxu1 %v2322_v8 }
 0x68c   : > { %2112 = vmatpush3.bf16.msra.mxu1 %v2213_v18 }
 0x68d   : > { %2113 = vmatprep.subr.bf16.mxu1 %v2322_v8 }
 0x690   : > { %2114 = vmatpush3.bf16.msra.mxu1 %v2214_v19 }
 0x691   : > { %2115 = vmatprep.subr.bf16.mxu1 %v2322_v8 }
 0x694   : > { %2116 = vmatpush3.bf16.msra.mxu1 %v2215_v20 }
 0x695   : > { %2117 = vmatprep.subr.bf16.mxu1 %v2322_v8 }
 0x698   : > { %2118 = vmatpush3.bf16.msra.mxu1 %v2216_v21 }
 0x699   : > { %2119 = vmatprep.subr.bf16.mxu1 %v2322_v8 }
 0x69c   : > { %2120 = vmatpush3.bf16.msra.mxu1 %v2217_v28 }
 0x752   : > { %v1545_v56 = vpop.f32.mrb[28].mxu1 }
 0x753   : > { %v1546_v57 = vadd.f32 %v1903_v55, %v1545_v56  ;;  %v2095_v58 = vpop.f32.mrb[29].mxu1  ;;  %v1915_v56 = vld [vmem:[%s2817_s11] ss:$0 sm:$0xff] }
 0x754   : > { %v1548_v59 = vpop.f32.mrb[30].mxu1 }
 0x755   : > { %v2700_v60 = vadd.f32 %v1546_v57, %v2473_v0  ;;  %v2096_v61 = vpop.f32.mrb[31].mxu1  ;;  %v2209_v0 = vld [vmem:[%s2814_s8 + $0x8] sm:$0xff]  }
 0x756   : > { %2100 = vmatpush3.bf16.msra.mxu0 %v2209_v0 }
 0x757   : > { %v1554_v62 = vsel %vm413_vm0, %v2700_v60, 0.0 }
 0x758   : > { %1555 = vadd.xlane.f32.xlu1 %v1554_v62 }
 0x7e5   : > { %v1556_v63 = vpop.xlane.xlu1 %1555 }
 0x7e6   : > { %v1557_v1 = vmul.f32 0.03125, %v1556_v63 }
 0x7e8   : > { %v1558_v30 = vsub.f32 %v2700_v60, %v1557_v1 }
 0x7ea   : > { %v1559_v2 = vmul.f32 %v1558_v30, %v1558_v30 }
 0x7ec   : > { %v1560_v3 = vsel %vm413_vm0, %v1559_v2, 0.0 }
 0x7ed   : > { %1561 = vadd.xlane.f32.xlu0 %v1560_v3 }
 0x87a   : > { %v1562_v4 = vpop.xlane.xlu0 %1561 }
 0x87b   : > { %v1563_v5 = vmul.f32 0.03125, %v1562_v4 }
 0x87d   : > { %v1564_v6 = vadd.f32 1e-05, %v1563_v5 }
 0x87f   : > { %2252 = vrsqrt.f32 %v1564_v6 }
 0x889   : > { %v2253_v7 = vpop.eup %2252 }
 0x88a   : > { %v1566_v10 = vmul.f32 %v2253_v7, %v1558_v30 }
 0x88c   : > { %v1573_v12 = vmul.f32 %v1907_v9, %v1566_v10 }
 0x88e   : > { %v1580_v13 = vadd.f32 %v1908_v11, %v1573_v12 }
 0x890   : > { %v1581_v14 = vpack.c.bf16 %v1580_v13, %v1580_v13 }
 0x892   : > { %2102 = vmatmul.mubr.msk.bf16.vlgmr.msra.gmra.mrb[40].mxu0 %vm413_vm0, %v1581_v14 }
 0x965   : > { %v1642_v29 = vpop.f32.mrb[40].mxu0 }
 0x966   : > { %v1643_v23 = vadd.f32 %v1909_v22, %v1642_v29  ;;  %v2103_v24 = vpop.f32.mrb[41].mxu0 }
 0x967   : > { %v1645_v26 = vpop.f32.mrb[42].mxu0 }
 0x968   : > { %v1648_v31 = vmul.f32 0.70710677, %v1643_v23  ;;  %v2104_v33 = vpop.f32.mrb[43].mxu0  ;;  %v1671_v52 = vmul.f32 0.5, %v1643_v23 }
 0x96a   : > { %v1649_v34 = vand.u32 2147483647, %v1648_v31  ;;  %vm1668_vm14 = vcmp.ge.f32.partialorder %v1648_v31, 0.0 }
 0x96c   : > { %v1650_v35 = vmul.f32 0.3275911, %v1649_v34  ;;  %v1662_v8 = vsub.f32 0.0, %v1649_v34 }
 0x96e   : > { %v1651_v36 = vadd.f32 1.0, %v1650_v35  ;;  %v1663_v38 = vmul.f32 %v1662_v8, %v1649_v34 }
 0x970   : > { %2254 = vrcp.f32 %v1651_v36  ;;  %v1664_v41 = vmul.f32 1.442695, %v1663_v38 }
 0x972   : > { %2256 = vpow2.f32 %v1664_v41 }
 0x97a   : > { %v2255_v37 = vpop.eup %2254 }
 0x97b   : > { %v1653_v39 = vmul.f32 1.0614054, %v2255_v37 }
 0x97c   : > { %v2257_v49 = vpop.eup %2256 }
 0x97d   : > { %v1913_v40 = vadd.f32 -1.4531521, %v1653_v39 }
 0x97f   : > { %v1655_v42 = vmul.f32 %v2255_v37, %v1913_v40 }
 0x981   : > { %v1656_v43 = vadd.f32 1.4214138, %v1655_v42 }
 0x983   : > { %v1657_v44 = vmul.f32 %v2255_v37, %v1656_v43 }
 0x985   : > { %v1914_v45 = vadd.f32 -0.28449672, %v1657_v44 }
 0x987   : > { %v1659_v46 = vmul.f32 %v2255_v37, %v1914_v45 }
 0x989   : > { %v1660_v47 = vadd.f32 0.2548296, %v1659_v46 }
 0x98b   : > { %v1661_v48 = vmul.f32 %v2255_v37, %v1660_v47 }
 0x98d   : > { %v1666_v50 = vmul.f32 %v2257_v49, %v1661_v48 }
 0x98f   : > { %v1667_v51 = vsub.f32 1.0, %v1666_v50 }
 0x991   : > { %v1669_v25 = vsub.f32 0.0, %v1667_v51 }
 0x993   : > { %v1670_v27 = vsel %vm1668_vm14, %v1667_v51, %v1669_v25 }
 0x994   : > { %v1672_v53 = vadd.f32 1.0, %v1670_v27 }
 0x996   : > { %v1673_v54 = vmul.f32 %v1672_v53, %v1671_v52 }
 0x998   : > { %v1674_v55 = vpack.c.bf16 %v1673_v54, %v1673_v54 }
 0x99a   : > { %2122 = vmatmul.mubr.bf16.vlgmr.msra.gmra.mrb[32].mxu1 %v1674_v55 }
 0xa6d   : > { %v1780_v57 = vpop.f32.mrb[32].mxu1 }
 0xa6e   : > { %v1781_v58 = vadd.f32 %v1915_v56, %v1780_v57  ;;  %v2123_v59 = vpop.f32.mrb[33].mxu1 }
 0xa6f   : > { %v1783_v61 = vpop.f32.mrb[34].mxu1 }
 0xa70   : > { %v1786_v62 = vadd.f32 %v1781_v58, %v2700_v60  ;;  %v2124_v63 = vpop.f32.mrb[35].mxu1 }
 0xa72   : > { %1787 = vst.msk [vmem:[%s404_s29] sm:$0xff] %vm413_vm0, %v1786_v62 }
 0xa73   : > { %2271 = shalt.err (!%p2268_p3)
}
 0xa74   : > { %s2272_s18 = scalar_lea.hbm %s2763_s0, 128  ;;  %s2276_s16 = scalar_lea.hbm %s2818_s12, 256 }
 0xa75   : > { %p2273_p4 = scmp.ne.s32.totalorder %s2763_s0, %s2272_s18  ;;  %p2277_p9 = scmp.lt.u32.totalorder %s2763_s0, %s2818_s12 }
 0xa76   : > { %p2278_p10 = scmp.lt.u32.totalorder %s2276_s16, %s2272_s18  ;;  %p2280_p12 = scmp.lt.u32.totalorder %s2272_s18, %s2763_s0 }
 0xa77   : > { %p2274_p7 = pnand %p2273_p4, %p2458_p5 }
 0xa78   : > { %p2279_p11 = por %p2278_p10, %p2277_p9 }
 0xa79   : > { %p2275_p8 = pneg %p2274_p7 }
 0xa7a   : > { %p2281_p13 = por %p2280_p12, %p2279_p11 }
 0xa7c   : > { %p2282_p0 = pnand %p2281_p13, %p2275_p8 }
 0xa7e   : > { %2285 = shalt.err (!%p2282_p0)
}
 0xa7f   : > { %2125 = dma.vmem_to_hbm [thread:$0]  (%p2458_p5), %s2765_s15, 128, %s2763_s0, %s1789_s25  }
 0xa80 PF: > { %p2131_p1 = scmp.ge.s32.totalorder %s2320_s24, 2  ;;  %s1814_s1 = sand.u32 1, %s2308_s21  }
 0xa81   : > { %s1815_s19 = scalar_lea.sflag [#allocation5], %s1814_s1 }
 0xa82   : > { %p2128_p2 = pnand %p2131_p1, %p2462_p6 }
 0xa84   : > { %2303 = dma.done.wait (!%p2128_p2), %s1815_s19, 128  }
 0xa85   : > { %2305 = vsyncadd (!%p2128_p2), %s1815_s19, 4294967168  ;;  %p22_p3 = scmp.ge.s32.totalorder %s2445_s27, 4   ;;  %s2825_s21 = smov %s2312_s22 }
 0xa86   : > { %s2826_s22 = smov %s2316_s23  ;;  %s2827_s23 = smov %s2456_s30 }
 0xa87   : > { %s2828_s24 = smov %s2445_s27  ;;  %24 = sbr.rel (!%p22_p3) target bundleno = 6 (0x6), region = 103 }
 0xa8e   :  { %1820 = vsyncpa [#allocation5], 1 }
 0xa8f   :  { %1822 = vsyncpa [#allocation5 + $0x1], 1 }

</bundles_post_ra>
